<compile_context>
chip_gen: v7x
topology: tpu7x:2x2x1
jax: 0.10.0
libtpu: 0.0.40
codegen_flags: <defaults>
</compile_context>

<pallas_src>
import jax
import jax.numpy as jnp
from jax.experimental import pallas as pl
from jax.experimental.pallas import tpu as pltpu

EPS = 1e-5  # InstanceNorm2d default eps


# --------------------------------- kernel -----------------------------------

def _make_kernel(H, W):
    HW = H * W

    def kernel(x_ref, rc_ref, w1_ref, b1_ref, w2_ref, b2_ref, o_ref):
        # x_ref : (1, Cp, HW) f32  lane-dense activation slab
        # rc_ref: (2, HW)     i32  (row index, col index) of each lane
        # w*_ref: (9, Cp, Cp) f32  one (Cout, Cin) matrix per 3x3 tap
        # b*_ref: (Cp, 1)     f32
        Cp = x_ref.shape[1]
        x = x_ref[0]                                        # (Cp, HW)

        row = rc_ref[0:1, :]                                # (1, HW)
        col = rc_ref[1:2, :]
        h_first, h_last = row == 0, row == H - 1
        w_first, w_last = col == 0, col == W - 1
        inv_hw = jnp.float32(1.0 / HW)

        def conv3x3_instnorm(inp, w_ref, b_ref):
            # Reflection-padded 3x3 conv as 9 shifted slabs contracted on the
            # MXU.  Shifts are lane rolls; reflection at the image borders is
            # a masked select against the oppositely-rolled slab.
            up = jnp.roll(inp, -W, axis=1)                  # source row h+1
            down = jnp.roll(inp, W, axis=1)                 # source row h-1
            rows = (jnp.where(h_first, up, down),           # dh = -1 (reflect)
                    inp,                                    # dh =  0
                    jnp.where(h_last, down, up))            # dh = +1 (reflect)

            acc = None
            for kh in range(3):
                r = rows[kh]
                left = jnp.roll(r, 1, axis=1)               # source col w-1
                right = jnp.roll(r, -1, axis=1)             # source col w+1
                cols = (jnp.where(w_first, right, left),    # dw = -1 (reflect)
                        r,                                  # dw =  0
                        jnp.where(w_last, left, right))     # dw = +1 (reflect)
                for kw in range(3):
                    contrib = jnp.dot(
                        w_ref[kh * 3 + kw], cols[kw],
                        precision=jax.lax.Precision.HIGHEST,
                        preferred_element_type=jnp.float32)
                    acc = contrib if acc is None else acc + contrib
            acc = acc + b_ref[...]                          # (Cp, 1) broadcast

            # Single-pass instance norm over the flattened spatial axis.
            mu = jnp.sum(acc, axis=1, keepdims=True) * inv_hw
            ex2 = jnp.sum(acc * acc, axis=1, keepdims=True) * inv_hw
            var = ex2 - mu * mu
            return (acc - mu) * jax.lax.rsqrt(var + EPS)

        h1 = jnp.maximum(conv3x3_instnorm(x, w1_ref, b1_ref), 0.0)
        y2 = conv3x3_instnorm(h1, w2_ref, b2_ref)
        o_ref[0] = x + y2                                   # residual add

    return kernel


# --------------------------------- wrapper -----------------------------------

@jax.jit
def residual_block(x, w1, b1, w2, b2):
    B, C, H, W = x.shape
    HW = H * W
    Cp = 8 * ((C + 7) // 8)        # pad channels to a full sublane tile
    pc = Cp - C

    # Lane-dense (B, Cp, H*W) activation slab; extra channels are zero.
    x_flat = jnp.pad(x.reshape(B, C, HW), ((0, 0), (0, pc), (0, 0)))

    # (Cout, Cin, 3, 3) -> (9, Cp, Cp): one MXU matrix per conv tap.
    def prep_w(w):
        wt = jnp.transpose(w, (2, 3, 0, 1))                 # (3,3,Cout,Cin)
        wt = jnp.pad(wt, ((0, 0), (0, 0), (0, pc), (0, pc)))
        return wt.reshape(9, Cp, Cp)

    w1t, w2t = prep_w(w1), prep_w(w2)
    b1c = jnp.pad(b1, (0, pc)).reshape(Cp, 1)
    b2c = jnp.pad(b2, (0, pc)).reshape(Cp, 1)

    pos = jnp.arange(HW, dtype=jnp.int32)
    rc = jnp.stack([pos // W, pos % W], axis=0)             # (2, HW)

    out_flat = pl.pallas_call(
        _make_kernel(H, W),
        out_shape=jax.ShapeDtypeStruct((B, Cp, HW), jnp.float32),
        grid=(B,),
        in_specs=[
            pl.BlockSpec((1, Cp, HW), lambda b: (b, 0, 0)),
            pl.BlockSpec((2, HW), lambda b: (0, 0)),
            pl.BlockSpec((9, Cp, Cp), lambda b: (0, 0, 0)),
            pl.BlockSpec((Cp, 1), lambda b: (0, 0)),
            pl.BlockSpec((9, Cp, Cp), lambda b: (0, 0, 0)),
            pl.BlockSpec((Cp, 1), lambda b: (0, 0)),
        ],
        out_specs=pl.BlockSpec((1, Cp, HW), lambda b: (b, 0, 0)),
        compiler_params=pltpu.CompilerParams(
            dimension_semantics=("parallel",)),
    )(x_flat, rc, w1t, b1c, w2t, b2c)

    return out_flat[:, :C, :].reshape(B, C, H, W)


# ----------------------------- pure-JAX reference ----------------------------

def ref_residual_block(x, w1, b1, w2, b2):
    def conv(inp, w, b):
        pad = jnp.pad(inp, ((0, 0), (0, 0), (1, 1), (1, 1)), mode="reflect")
        y = jax.lax.conv_general_dilated(
            pad, w, (1, 1), "VALID",
            dimension_numbers=("NCHW", "OIHW", "NCHW"),
            precision=jax.lax.Precision.HIGHEST)
        return y + b[None, :, None, None]

    def inorm(y):
        mu = jnp.mean(y, axis=(2, 3), keepdims=True)
        var = jnp.mean((y - mu) ** 2, axis=(2, 3), keepdims=True)
        return (y - mu) / jnp.sqrt(var + EPS)

    h = jax.nn.relu(inorm(conv(x, w1, b1)))
    return x + inorm(conv(h, w2, b2))


# ----------------------------------- main ------------------------------------

if __name__ == "__main__":
    B, C, H, W = 2, 4, 16, 16
    key = jax.random.PRNGKey(0)
    kx, kw1, kb1, kw2, kb2 = jax.random.split(key, 5)

    x = jax.random.normal(kx, (B, C, H, W), dtype=jnp.float32)
    scale = 1.0 / (C * 9) ** 0.5  # ~ PyTorch conv init scale (deterministic)
    w1 = jax.random.normal(kw1, (C, C, 3, 3), dtype=jnp.float32) * scale
    b1 = jax.random.normal(kb1, (C,), dtype=jnp.float32) * scale
    w2 = jax.random.normal(kw2, (C, C, 3, 3), dtype=jnp.float32) * scale
    b2 = jax.random.normal(kb2, (C,), dtype=jnp.float32) * scale

    out = jax.block_until_ready(residual_block(x, w1, b1, w2, b2))
    ref = jax.block_until_ready(ref_residual_block(x, w1, b1, w2, b2))

    assert out.shape == (B, C, H, W), out.shape
    err = float(jnp.max(jnp.abs(out - ref)))
    assert jnp.allclose(out, ref, atol=1e-4, rtol=1e-4), err
    print("KERNEL_OK")
</pallas_src>

<mosaic_0001>
module attributes {stable_mosaic.version = 11 : i64} {
  func.func @kernel(%arg0: i32, %arg1: memref<1x8x256xf32, #tpu.memory_space<vmem>>, %arg2: memref<2x256xi32, #tpu.memory_space<vmem>>, %arg3: memref<9x8x8xf32, #tpu.memory_space<vmem>>, %arg4: memref<8x1xf32, #tpu.memory_space<vmem>>, %arg5: memref<9x8x8xf32, #tpu.memory_space<vmem>>, %arg6: memref<8x1xf32, #tpu.memory_space<vmem>>, %arg7: memref<1x8x256xf32, #tpu.memory_space<vmem>>) attributes {dimension_semantics = [#tpu.dimension_semantics<parallel>], iteration_bounds = array<i64: 2>, scalar_prefetch = 0 : i64, scratch_operands = 0 : i64, tpu.core_type = #tpu.core_type<tc>, window_params = [{transform_indices = @transform_0, window_bounds = array<i64: 1, 8, 256>}, {pipeline_mode = #tpu.pipeline_mode<synchronous>, transform_indices = @transform_1, window_bounds = array<i64: 2, 256>}, {pipeline_mode = #tpu.pipeline_mode<synchronous>, transform_indices = @transform_2, window_bounds = array<i64: 9, 8, 8>}, {pipeline_mode = #tpu.pipeline_mode<synchronous>, transform_indices = @transform_3, window_bounds = array<i64: 8, 1>}, {pipeline_mode = #tpu.pipeline_mode<synchronous>, transform_indices = @transform_4, window_bounds = array<i64: 9, 8, 8>}, {pipeline_mode = #tpu.pipeline_mode<synchronous>, transform_indices = @transform_5, window_bounds = array<i64: 8, 1>}, {transform_indices = @transform_6, window_bounds = array<i64: 1, 8, 256>}]} {
    %c0 = arith.constant 0 : index
    %c0_0 = arith.constant 0 : index
    %c0_1 = arith.constant 0 : index
    %0 = vector.load %arg1[%c0, %c0_0, %c0_1] : memref<1x8x256xf32, #tpu.memory_space<vmem>>, vector<1x8x256xf32>
    %1 = vector.shape_cast %0 : vector<1x8x256xf32> to vector<8x256xf32>
    %c0_2 = arith.constant 0 : index
    %c0_3 = arith.constant 0 : index
    %2 = vector.load %arg2[%c0_2, %c0_3] : memref<2x256xi32, #tpu.memory_space<vmem>>, vector<1x256xi32>
    %c1 = arith.constant 1 : index
    %c0_4 = arith.constant 0 : index
    %3 = vector.load %arg2[%c1, %c0_4] : memref<2x256xi32, #tpu.memory_space<vmem>>, vector<1x256xi32>
    %c0_i32 = arith.constant 0 : i32
    %4 = vector.broadcast %c0_i32 : i32 to vector<1x256xi32>
    %5 = arith.cmpi eq, %2, %4 : vector<1x256xi32>
    %c15_i32 = arith.constant 15 : i32
    %6 = vector.broadcast %c15_i32 : i32 to vector<1x256xi32>
    %7 = arith.cmpi eq, %2, %6 : vector<1x256xi32>
    %c0_i32_5 = arith.constant 0 : i32
    %8 = vector.broadcast %c0_i32_5 : i32 to vector<1x256xi32>
    %9 = arith.cmpi eq, %3, %8 : vector<1x256xi32>
    %c15_i32_6 = arith.constant 15 : i32
    %10 = vector.broadcast %c15_i32_6 : i32 to vector<1x256xi32>
    %11 = arith.cmpi eq, %3, %10 : vector<1x256xi32>
    %12 = vector.extract_strided_slice %1 {offsets = [0, 16], sizes = [8, 240], strides = [1, 1]} : vector<8x256xf32> to vector<8x240xf32>
    %13 = vector.extract_strided_slice %1 {offsets = [0, 0], sizes = [8, 16], strides = [1, 1]} : vector<8x256xf32> to vector<8x16xf32>
    %14 = tpu.concatenate %12, %13 in 1 : vector<8x240xf32>, vector<8x16xf32> -> vector<8x256xf32>
    %15 = vector.extract_strided_slice %1 {offsets = [0, 240], sizes = [8, 16], strides = [1, 1]} : vector<8x256xf32> to vector<8x16xf32>
    %16 = vector.extract_strided_slice %1 {offsets = [0, 0], sizes = [8, 240], strides = [1, 1]} : vector<8x256xf32> to vector<8x240xf32>
    %17 = tpu.concatenate %15, %16 in 1 : vector<8x16xf32>, vector<8x240xf32> -> vector<8x256xf32>
    %18 = vector.shape_cast %5 : vector<1x256xi1> to vector<1x256xi1>
    %19 = vector.broadcast %18 : vector<1x256xi1> to vector<8x256xi1>
    %20 = arith.select %19, %14, %17 : vector<8x256xi1>, vector<8x256xf32>
    %21 = vector.shape_cast %7 : vector<1x256xi1> to vector<1x256xi1>
    %22 = vector.broadcast %21 : vector<1x256xi1> to vector<8x256xi1>
    %23 = arith.select %22, %17, %14 : vector<8x256xi1>, vector<8x256xf32>
    %24 = vector.extract_strided_slice %20 {offsets = [0, 255], sizes = [8, 1], strides = [1, 1]} : vector<8x256xf32> to vector<8x1xf32>
    %25 = vector.extract_strided_slice %20 {offsets = [0, 0], sizes = [8, 255], strides = [1, 1]} : vector<8x256xf32> to vector<8x255xf32>
    %26 = tpu.concatenate %24, %25 in 1 : vector<8x1xf32>, vector<8x255xf32> -> vector<8x256xf32>
    %27 = vector.extract_strided_slice %20 {offsets = [0, 1], sizes = [8, 255], strides = [1, 1]} : vector<8x256xf32> to vector<8x255xf32>
    %28 = vector.extract_strided_slice %20 {offsets = [0, 0], sizes = [8, 1], strides = [1, 1]} : vector<8x256xf32> to vector<8x1xf32>
    %29 = tpu.concatenate %27, %28 in 1 : vector<8x255xf32>, vector<8x1xf32> -> vector<8x256xf32>
    %30 = vector.shape_cast %9 : vector<1x256xi1> to vector<1x256xi1>
    %31 = vector.broadcast %30 : vector<1x256xi1> to vector<8x256xi1>
    %32 = arith.select %31, %29, %26 : vector<8x256xi1>, vector<8x256xf32>
    %33 = vector.shape_cast %11 : vector<1x256xi1> to vector<1x256xi1>
    %34 = vector.broadcast %33 : vector<1x256xi1> to vector<8x256xi1>
    %35 = arith.select %34, %26, %29 : vector<8x256xi1>, vector<8x256xf32>
    %c0_7 = arith.constant 0 : index
    %c0_8 = arith.constant 0 : index
    %c0_9 = arith.constant 0 : index
    %36 = vector.load %arg3[%c0_7, %c0_8, %c0_9] : memref<9x8x8xf32, #tpu.memory_space<vmem>>, vector<1x8x8xf32>
    %37 = vector.shape_cast %36 : vector<1x8x8xf32> to vector<8x8xf32>
    %cst = arith.constant dense<0.000000e+00> : vector<8x256xf32>
    %38 = tpu.matmul %37, %32, %cst {dimension_numbers = #tpu.dot_dimension_numbers<[1], [0], [0], [1], [0, 0, 1, 1], [], []>, precision = #tpu.contract_precision<fp32>} : vector<8x8xf32>, vector<8x256xf32>, vector<8x256xf32> -> vector<8x256xf32>
    %c1_10 = arith.constant 1 : index
    %c0_11 = arith.constant 0 : index
    %c0_12 = arith.constant 0 : index
    %39 = vector.load %arg3[%c1_10, %c0_11, %c0_12] : memref<9x8x8xf32, #tpu.memory_space<vmem>>, vector<1x8x8xf32>
    %40 = vector.shape_cast %39 : vector<1x8x8xf32> to vector<8x8xf32>
    %cst_13 = arith.constant dense<0.000000e+00> : vector<8x256xf32>
    %41 = tpu.matmul %40, %20, %cst_13 {dimension_numbers = #tpu.dot_dimension_numbers<[1], [0], [0], [1], [0, 0, 1, 1], [], []>, precision = #tpu.contract_precision<fp32>} : vector<8x8xf32>, vector<8x256xf32>, vector<8x256xf32> -> vector<8x256xf32>
    %42 = arith.addf %38, %41 : vector<8x256xf32>
    %c2 = arith.constant 2 : index
    %c0_14 = arith.constant 0 : index
    %c0_15 = arith.constant 0 : index
    %43 = vector.load %arg3[%c2, %c0_14, %c0_15] : memref<9x8x8xf32, #tpu.memory_space<vmem>>, vector<1x8x8xf32>
    %44 = vector.shape_cast %43 : vector<1x8x8xf32> to vector<8x8xf32>
    %cst_16 = arith.constant dense<0.000000e+00> : vector<8x256xf32>
    %45 = tpu.matmul %44, %35, %cst_16 {dimension_numbers = #tpu.dot_dimension_numbers<[1], [0], [0], [1], [0, 0, 1, 1], [], []>, precision = #tpu.contract_precision<fp32>} : vector<8x8xf32>, vector<8x256xf32>, vector<8x256xf32> -> vector<8x256xf32>
    %46 = arith.addf %42, %45 : vector<8x256xf32>
    %47 = vector.extract_strided_slice %1 {offsets = [0, 255], sizes = [8, 1], strides = [1, 1]} : vector<8x256xf32> to vector<8x1xf32>
    %48 = vector.extract_strided_slice %1 {offsets = [0, 0], sizes = [8, 255], strides = [1, 1]} : vector<8x256xf32> to vector<8x255xf32>
    %49 = tpu.concatenate %47, %48 in 1 : vector<8x1xf32>, vector<8x255xf32> -> vector<8x256xf32>
    %50 = vector.extract_strided_slice %1 {offsets = [0, 1], sizes = [8, 255], strides = [1, 1]} : vector<8x256xf32> to vector<8x255xf32>
    %51 = vector.extract_strided_slice %1 {offsets = [0, 0], sizes = [8, 1], strides = [1, 1]} : vector<8x256xf32> to vector<8x1xf32>
    %52 = tpu.concatenate %50, %51 in 1 : vector<8x255xf32>, vector<8x1xf32> -> vector<8x256xf32>
    %53 = vector.shape_cast %9 : vector<1x256xi1> to vector<1x256xi1>
    %54 = vector.broadcast %53 : vector<1x256xi1> to vector<8x256xi1>
    %55 = arith.select %54, %52, %49 : vector<8x256xi1>, vector<8x256xf32>
    %56 = vector.shape_cast %11 : vector<1x256xi1> to vector<1x256xi1>
    %57 = vector.broadcast %56 : vector<1x256xi1> to vector<8x256xi1>
    %58 = arith.select %57, %49, %52 : vector<8x256xi1>, vector<8x256xf32>
    %c3 = arith.constant 3 : index
    %c0_17 = arith.constant 0 : index
    %c0_18 = arith.constant 0 : index
    %59 = vector.load %arg3[%c3, %c0_17, %c0_18] : memref<9x8x8xf32, #tpu.memory_space<vmem>>, vector<1x8x8xf32>
    %60 = vector.shape_cast %59 : vector<1x8x8xf32> to vector<8x8xf32>
    %cst_19 = arith.constant dense<0.000000e+00> : vector<8x256xf32>
    %61 = tpu.matmul %60, %55, %cst_19 {dimension_numbers = #tpu.dot_dimension_numbers<[1], [0], [0], [1], [0, 0, 1, 1], [], []>, precision = #tpu.contract_precision<fp32>} : vector<8x8xf32>, vector<8x256xf32>, vector<8x256xf32> -> vector<8x256xf32>
    %62 = arith.addf %46, %61 : vector<8x256xf32>
    %c4 = arith.constant 4 : index
    %c0_20 = arith.constant 0 : index
    %c0_21 = arith.constant 0 : index
    %63 = vector.load %arg3[%c4, %c0_20, %c0_21] : memref<9x8x8xf32, #tpu.memory_space<vmem>>, vector<1x8x8xf32>
    %64 = vector.shape_cast %63 : vector<1x8x8xf32> to vector<8x8xf32>
    %cst_22 = arith.constant dense<0.000000e+00> : vector<8x256xf32>
    %65 = tpu.matmul %64, %1, %cst_22 {dimension_numbers = #tpu.dot_dimension_numbers<[1], [0], [0], [1], [0, 0, 1, 1], [], []>, precision = #tpu.contract_precision<fp32>} : vector<8x8xf32>, vector<8x256xf32>, vector<8x256xf32> -> vector<8x256xf32>
    %66 = arith.addf %62, %65 : vector<8x256xf32>
    %c5 = arith.constant 5 : index
    %c0_23 = arith.constant 0 : index
    %c0_24 = arith.constant 0 : index
    %67 = vector.load %arg3[%c5, %c0_23, %c0_24] : memref<9x8x8xf32, #tpu.memory_space<vmem>>, vector<1x8x8xf32>
    %68 = vector.shape_cast %67 : vector<1x8x8xf32> to vector<8x8xf32>
    %cst_25 = arith.constant dense<0.000000e+00> : vector<8x256xf32>
    %69 = tpu.matmul %68, %58, %cst_25 {dimension_numbers = #tpu.dot_dimension_numbers<[1], [0], [0], [1], [0, 0, 1, 1], [], []>, precision = #tpu.contract_precision<fp32>} : vector<8x8xf32>, vector<8x256xf32>, vector<8x256xf32> -> vector<8x256xf32>
    %70 = arith.addf %66, %69 : vector<8x256xf32>
    %71 = vector.extract_strided_slice %23 {offsets = [0, 255], sizes = [8, 1], strides = [1, 1]} : vector<8x256xf32> to vector<8x1xf32>
    %72 = vector.extract_strided_slice %23 {offsets = [0, 0], sizes = [8, 255], strides = [1, 1]} : vector<8x256xf32> to vector<8x255xf32>
    %73 = tpu.concatenate %71, %72 in 1 : vector<8x1xf32>, vector<8x255xf32> -> vector<8x256xf32>
    %74 = vector.extract_strided_slice %23 {offsets = [0, 1], sizes = [8, 255], strides = [1, 1]} : vector<8x256xf32> to vector<8x255xf32>
    %75 = vector.extract_strided_slice %23 {offsets = [0, 0], sizes = [8, 1], strides = [1, 1]} : vector<8x256xf32> to vector<8x1xf32>
    %76 = tpu.concatenate %74, %75 in 1 : vector<8x255xf32>, vector<8x1xf32> -> vector<8x256xf32>
    %77 = vector.shape_cast %9 : vector<1x256xi1> to vector<1x256xi1>
    %78 = vector.broadcast %77 : vector<1x256xi1> to vector<8x256xi1>
    %79 = arith.select %78, %76, %73 : vector<8x256xi1>, vector<8x256xf32>
    %80 = vector.shape_cast %11 : vector<1x256xi1> to vector<1x256xi1>
    %81 = vector.broadcast %80 : vector<1x256xi1> to vector<8x256xi1>
    %82 = arith.select %81, %73, %76 : vector<8x256xi1>, vector<8x256xf32>
    %c6 = arith.constant 6 : index
    %c0_26 = arith.constant 0 : index
    %c0_27 = arith.constant 0 : index
    %83 = vector.load %arg3[%c6, %c0_26, %c0_27] : memref<9x8x8xf32, #tpu.memory_space<vmem>>, vector<1x8x8xf32>
    %84 = vector.shape_cast %83 : vector<1x8x8xf32> to vector<8x8xf32>
    %cst_28 = arith.constant dense<0.000000e+00> : vector<8x256xf32>
    %85 = tpu.matmul %84, %79, %cst_28 {dimension_numbers = #tpu.dot_dimension_numbers<[1], [0], [0], [1], [0, 0, 1, 1], [], []>, precision = #tpu.contract_precision<fp32>} : vector<8x8xf32>, vector<8x256xf32>, vector<8x256xf32> -> vector<8x256xf32>
    %86 = arith.addf %70, %85 : vector<8x256xf32>
    %c7 = arith.constant 7 : index
    %c0_29 = arith.constant 0 : index
    %c0_30 = arith.constant 0 : index
    %87 = vector.load %arg3[%c7, %c0_29, %c0_30] : memref<9x8x8xf32, #tpu.memory_space<vmem>>, vector<1x8x8xf32>
    %88 = vector.shape_cast %87 : vector<1x8x8xf32> to vector<8x8xf32>
    %cst_31 = arith.constant dense<0.000000e+00> : vector<8x256xf32>
    %89 = tpu.matmul %88, %23, %cst_31 {dimension_numbers = #tpu.dot_dimension_numbers<[1], [0], [0], [1], [0, 0, 1, 1], [], []>, precision = #tpu.contract_precision<fp32>} : vector<8x8xf32>, vector<8x256xf32>, vector<8x256xf32> -> vector<8x256xf32>
    %90 = arith.addf %86, %89 : vector<8x256xf32>
    %c8 = arith.constant 8 : index
    %c0_32 = arith.constant 0 : index
    %c0_33 = arith.constant 0 : index
    %91 = vector.load %arg3[%c8, %c0_32, %c0_33] : memref<9x8x8xf32, #tpu.memory_space<vmem>>, vector<1x8x8xf32>
    %92 = vector.shape_cast %91 : vector<1x8x8xf32> to vector<8x8xf32>
    %cst_34 = arith.constant dense<0.000000e+00> : vector<8x256xf32>
    %93 = tpu.matmul %92, %82, %cst_34 {dimension_numbers = #tpu.dot_dimension_numbers<[1], [0], [0], [1], [0, 0, 1, 1], [], []>, precision = #tpu.contract_precision<fp32>} : vector<8x8xf32>, vector<8x256xf32>, vector<8x256xf32> -> vector<8x256xf32>
    %94 = arith.addf %90, %93 : vector<8x256xf32>
    %c0_35 = arith.constant 0 : index
    %c0_36 = arith.constant 0 : index
    %95 = vector.load %arg4[%c0_35, %c0_36] : memref<8x1xf32, #tpu.memory_space<vmem>>, vector<8x1xf32>
    %96 = vector.broadcast %95 : vector<8x1xf32> to vector<8x256xf32>
    %97 = arith.addf %94, %96 : vector<8x256xf32>
    %cst_37 = arith.constant dense<0.000000e+00> : vector<8xf32>
    %98 = vector.multi_reduction <add>, %97, %cst_37 [1] : vector<8x256xf32> to vector<8xf32>
    %99 = vector.shape_cast %98 : vector<8xf32> to vector<8x1xf32>
    %cst_38 = arith.constant 3.906250e-03 : f32
    %100 = vector.broadcast %cst_38 : f32 to vector<8x1xf32>
    %101 = arith.mulf %99, %100 : vector<8x1xf32>
    %102 = arith.mulf %97, %97 : vector<8x256xf32>
    %cst_39 = arith.constant dense<0.000000e+00> : vector<8xf32>
    %103 = vector.multi_reduction <add>, %102, %cst_39 [1] : vector<8x256xf32> to vector<8xf32>
    %104 = vector.shape_cast %103 : vector<8xf32> to vector<8x1xf32>
    %cst_40 = arith.constant 3.906250e-03 : f32
    %105 = vector.broadcast %cst_40 : f32 to vector<8x1xf32>
    %106 = arith.mulf %104, %105 : vector<8x1xf32>
    %107 = arith.mulf %101, %101 : vector<8x1xf32>
    %108 = arith.subf %106, %107 : vector<8x1xf32>
    %109 = vector.broadcast %101 : vector<8x1xf32> to vector<8x256xf32>
    %110 = arith.subf %97, %109 : vector<8x256xf32>
    %cst_41 = arith.constant 9.99999974E-6 : f32
    %111 = vector.broadcast %cst_41 : f32 to vector<8x1xf32>
    %112 = arith.addf %108, %111 : vector<8x1xf32>
    %113 = math.rsqrt %112 : vector<8x1xf32>
    %114 = vector.broadcast %113 : vector<8x1xf32> to vector<8x256xf32>
    %115 = arith.mulf %110, %114 : vector<8x256xf32>
    %cst_42 = arith.constant 0.000000e+00 : f32
    %116 = vector.broadcast %cst_42 : f32 to vector<8x256xf32>
    %117 = arith.maximumf %115, %116 : vector<8x256xf32>
    %118 = vector.extract_strided_slice %117 {offsets = [0, 16], sizes = [8, 240], strides = [1, 1]} : vector<8x256xf32> to vector<8x240xf32>
    %119 = vector.extract_strided_slice %117 {offsets = [0, 0], sizes = [8, 16], strides = [1, 1]} : vector<8x256xf32> to vector<8x16xf32>
    %120 = tpu.concatenate %118, %119 in 1 : vector<8x240xf32>, vector<8x16xf32> -> vector<8x256xf32>
    %121 = vector.extract_strided_slice %117 {offsets = [0, 240], sizes = [8, 16], strides = [1, 1]} : vector<8x256xf32> to vector<8x16xf32>
    %122 = vector.extract_strided_slice %117 {offsets = [0, 0], sizes = [8, 240], strides = [1, 1]} : vector<8x256xf32> to vector<8x240xf32>
    %123 = tpu.concatenate %121, %122 in 1 : vector<8x16xf32>, vector<8x240xf32> -> vector<8x256xf32>
    %124 = vector.shape_cast %5 : vector<1x256xi1> to vector<1x256xi1>
    %125 = vector.broadcast %124 : vector<1x256xi1> to vector<8x256xi1>
    %126 = arith.select %125, %120, %123 : vector<8x256xi1>, vector<8x256xf32>
    %127 = vector.shape_cast %7 : vector<1x256xi1> to vector<1x256xi1>
    %128 = vector.broadcast %127 : vector<1x256xi1> to vector<8x256xi1>
    %129 = arith.select %128, %123, %120 : vector<8x256xi1>, vector<8x256xf32>
    %130 = vector.extract_strided_slice %126 {offsets = [0, 255], sizes = [8, 1], strides = [1, 1]} : vector<8x256xf32> to vector<8x1xf32>
    %131 = vector.extract_strided_slice %126 {offsets = [0, 0], sizes = [8, 255], strides = [1, 1]} : vector<8x256xf32> to vector<8x255xf32>
    %132 = tpu.concatenate %130, %131 in 1 : vector<8x1xf32>, vector<8x255xf32> -> vector<8x256xf32>
    %133 = vector.extract_strided_slice %126 {offsets = [0, 1], sizes = [8, 255], strides = [1, 1]} : vector<8x256xf32> to vector<8x255xf32>
    %134 = vector.extract_strided_slice %126 {offsets = [0, 0], sizes = [8, 1], strides = [1, 1]} : vector<8x256xf32> to vector<8x1xf32>
    %135 = tpu.concatenate %133, %134 in 1 : vector<8x255xf32>, vector<8x1xf32> -> vector<8x256xf32>
    %136 = vector.shape_cast %9 : vector<1x256xi1> to vector<1x256xi1>
    %137 = vector.broadcast %136 : vector<1x256xi1> to vector<8x256xi1>
    %138 = arith.select %137, %135, %132 : vector<8x256xi1>, vector<8x256xf32>
    %139 = vector.shape_cast %11 : vector<1x256xi1> to vector<1x256xi1>
    %140 = vector.broadcast %139 : vector<1x256xi1> to vector<8x256xi1>
    %141 = arith.select %140, %132, %135 : vector<8x256xi1>, vector<8x256xf32>
    %c0_43 = arith.constant 0 : index
    %c0_44 = arith.constant 0 : index
    %c0_45 = arith.constant 0 : index
    %142 = vector.load %arg5[%c0_43, %c0_44, %c0_45] : memref<9x8x8xf32, #tpu.memory_space<vmem>>, vector<1x8x8xf32>
    %143 = vector.shape_cast %142 : vector<1x8x8xf32> to vector<8x8xf32>
    %cst_46 = arith.constant dense<0.000000e+00> : vector<8x256xf32>
    %144 = tpu.matmul %143, %138, %cst_46 {dimension_numbers = #tpu.dot_dimension_numbers<[1], [0], [0], [1], [0, 0, 1, 1], [], []>, precision = #tpu.contract_precision<fp32>} : vector<8x8xf32>, vector<8x256xf32>, vector<8x256xf32> -> vector<8x256xf32>
    %c1_47 = arith.constant 1 : index
    %c0_48 = arith.constant 0 : index
    %c0_49 = arith.constant 0 : index
    %145 = vector.load %arg5[%c1_47, %c0_48, %c0_49] : memref<9x8x8xf32, #tpu.memory_space<vmem>>, vector<1x8x8xf32>
    %146 = vector.shape_cast %145 : vector<1x8x8xf32> to vector<8x8xf32>
    %cst_50 = arith.constant dense<0.000000e+00> : vector<8x256xf32>
    %147 = tpu.matmul %146, %126, %cst_50 {dimension_numbers = #tpu.dot_dimension_numbers<[1], [0], [0], [1], [0, 0, 1, 1], [], []>, precision = #tpu.contract_precision<fp32>} : vector<8x8xf32>, vector<8x256xf32>, vector<8x256xf32> -> vector<8x256xf32>
    %148 = arith.addf %144, %147 : vector<8x256xf32>
    %c2_51 = arith.constant 2 : index
    %c0_52 = arith.constant 0 : index
    %c0_53 = arith.constant 0 : index
    %149 = vector.load %arg5[%c2_51, %c0_52, %c0_53] : memref<9x8x8xf32, #tpu.memory_space<vmem>>, vector<1x8x8xf32>
    %150 = vector.shape_cast %149 : vector<1x8x8xf32> to vector<8x8xf32>
    %cst_54 = arith.constant dense<0.000000e+00> : vector<8x256xf32>
    %151 = tpu.matmul %150, %141, %cst_54 {dimension_numbers = #tpu.dot_dimension_numbers<[1], [0], [0], [1], [0, 0, 1, 1], [], []>, precision = #tpu.contract_precision<fp32>} : vector<8x8xf32>, vector<8x256xf32>, vector<8x256xf32> -> vector<8x256xf32>
    %152 = arith.addf %148, %151 : vector<8x256xf32>
    %153 = vector.extract_strided_slice %117 {offsets = [0, 255], sizes = [8, 1], strides = [1, 1]} : vector<8x256xf32> to vector<8x1xf32>
    %154 = vector.extract_strided_slice %117 {offsets = [0, 0], sizes = [8, 255], strides = [1, 1]} : vector<8x256xf32> to vector<8x255xf32>
    %155 = tpu.concatenate %153, %154 in 1 : vector<8x1xf32>, vector<8x255xf32> -> vector<8x256xf32>
    %156 = vector.extract_strided_slice %117 {offsets = [0, 1], sizes = [8, 255], strides = [1, 1]} : vector<8x256xf32> to vector<8x255xf32>
    %157 = vector.extract_strided_slice %117 {offsets = [0, 0], sizes = [8, 1], strides = [1, 1]} : vector<8x256xf32> to vector<8x1xf32>
    %158 = tpu.concatenate %156, %157 in 1 : vector<8x255xf32>, vector<8x1xf32> -> vector<8x256xf32>
    %159 = vector.shape_cast %9 : vector<1x256xi1> to vector<1x256xi1>
    %160 = vector.broadcast %159 : vector<1x256xi1> to vector<8x256xi1>
    %161 = arith.select %160, %158, %155 : vector<8x256xi1>, vector<8x256xf32>
    %162 = vector.shape_cast %11 : vector<1x256xi1> to vector<1x256xi1>
    %163 = vector.broadcast %162 : vector<1x256xi1> to vector<8x256xi1>
    %164 = arith.select %163, %155, %158 : vector<8x256xi1>, vector<8x256xf32>
    %c3_55 = arith.constant 3 : index
    %c0_56 = arith.constant 0 : index
    %c0_57 = arith.constant 0 : index
    %165 = vector.load %arg5[%c3_55, %c0_56, %c0_57] : memref<9x8x8xf32, #tpu.memory_space<vmem>>, vector<1x8x8xf32>
    %166 = vector.shape_cast %165 : vector<1x8x8xf32> to vector<8x8xf32>
    %cst_58 = arith.constant dense<0.000000e+00> : vector<8x256xf32>
    %167 = tpu.matmul %166, %161, %cst_58 {dimension_numbers = #tpu.dot_dimension_numbers<[1], [0], [0], [1], [0, 0, 1, 1], [], []>, precision = #tpu.contract_precision<fp32>} : vector<8x8xf32>, vector<8x256xf32>, vector<8x256xf32> -> vector<8x256xf32>
    %168 = arith.addf %152, %167 : vector<8x256xf32>
    %c4_59 = arith.constant 4 : index
    %c0_60 = arith.constant 0 : index
    %c0_61 = arith.constant 0 : index
    %169 = vector.load %arg5[%c4_59, %c0_60, %c0_61] : memref<9x8x8xf32, #tpu.memory_space<vmem>>, vector<1x8x8xf32>
    %170 = vector.shape_cast %169 : vector<1x8x8xf32> to vector<8x8xf32>
    %cst_62 = arith.constant dense<0.000000e+00> : vector<8x256xf32>
    %171 = tpu.matmul %170, %117, %cst_62 {dimension_numbers = #tpu.dot_dimension_numbers<[1], [0], [0], [1], [0, 0, 1, 1], [], []>, precision = #tpu.contract_precision<fp32>} : vector<8x8xf32>, vector<8x256xf32>, vector<8x256xf32> -> vector<8x256xf32>
    %172 = arith.addf %168, %171 : vector<8x256xf32>
    %c5_63 = arith.constant 5 : index
    %c0_64 = arith.constant 0 : index
    %c0_65 = arith.constant 0 : index
    %173 = vector.load %arg5[%c5_63, %c0_64, %c0_65] : memref<9x8x8xf32, #tpu.memory_space<vmem>>, vector<1x8x8xf32>
    %174 = vector.shape_cast %173 : vector<1x8x8xf32> to vector<8x8xf32>
    %cst_66 = arith.constant dense<0.000000e+00> : vector<8x256xf32>
    %175 = tpu.matmul %174, %164, %cst_66 {dimension_numbers = #tpu.dot_dimension_numbers<[1], [0], [0], [1], [0, 0, 1, 1], [], []>, precision = #tpu.contract_precision<fp32>} : vector<8x8xf32>, vector<8x256xf32>, vector<8x256xf32> -> vector<8x256xf32>
    %176 = arith.addf %172, %175 : vector<8x256xf32>
    %177 = vector.extract_strided_slice %129 {offsets = [0, 255], sizes = [8, 1], strides = [1, 1]} : vector<8x256xf32> to vector<8x1xf32>
    %178 = vector.extract_strided_slice %129 {offsets = [0, 0], sizes = [8, 255], strides = [1, 1]} : vector<8x256xf32> to vector<8x255xf32>
    %179 = tpu.concatenate %177, %178 in 1 : vector<8x1xf32>, vector<8x255xf32> -> vector<8x256xf32>
    %180 = vector.extract_strided_slice %129 {offsets = [0, 1], sizes = [8, 255], strides = [1, 1]} : vector<8x256xf32> to vector<8x255xf32>
    %181 = vector.extract_strided_slice %129 {offsets = [0, 0], sizes = [8, 1], strides = [1, 1]} : vector<8x256xf32> to vector<8x1xf32>
    %182 = tpu.concatenate %180, %181 in 1 : vector<8x255xf32>, vector<8x1xf32> -> vector<8x256xf32>
    %183 = vector.shape_cast %9 : vector<1x256xi1> to vector<1x256xi1>
    %184 = vector.broadcast %183 : vector<1x256xi1> to vector<8x256xi1>
    %185 = arith.select %184, %182, %179 : vector<8x256xi1>, vector<8x256xf32>
    %186 = vector.shape_cast %11 : vector<1x256xi1> to vector<1x256xi1>
    %187 = vector.broadcast %186 : vector<1x256xi1> to vector<8x256xi1>
    %188 = arith.select %187, %179, %182 : vector<8x256xi1>, vector<8x256xf32>
    %c6_67 = arith.constant 6 : index
    %c0_68 = arith.constant 0 : index
    %c0_69 = arith.constant 0 : index
    %189 = vector.load %arg5[%c6_67, %c0_68, %c0_69] : memref<9x8x8xf32, #tpu.memory_space<vmem>>, vector<1x8x8xf32>
    %190 = vector.shape_cast %189 : vector<1x8x8xf32> to vector<8x8xf32>
    %cst_70 = arith.constant dense<0.000000e+00> : vector<8x256xf32>
    %191 = tpu.matmul %190, %185, %cst_70 {dimension_numbers = #tpu.dot_dimension_numbers<[1], [0], [0], [1], [0, 0, 1, 1], [], []>, precision = #tpu.contract_precision<fp32>} : vector<8x8xf32>, vector<8x256xf32>, vector<8x256xf32> -> vector<8x256xf32>
    %192 = arith.addf %176, %191 : vector<8x256xf32>
    %c7_71 = arith.constant 7 : index
    %c0_72 = arith.constant 0 : index
    %c0_73 = arith.constant 0 : index
    %193 = vector.load %arg5[%c7_71, %c0_72, %c0_73] : memref<9x8x8xf32, #tpu.memory_space<vmem>>, vector<1x8x8xf32>
    %194 = vector.shape_cast %193 : vector<1x8x8xf32> to vector<8x8xf32>
    %cst_74 = arith.constant dense<0.000000e+00> : vector<8x256xf32>
    %195 = tpu.matmul %194, %129, %cst_74 {dimension_numbers = #tpu.dot_dimension_numbers<[1], [0], [0], [1], [0, 0, 1, 1], [], []>, precision = #tpu.contract_precision<fp32>} : vector<8x8xf32>, vector<8x256xf32>, vector<8x256xf32> -> vector<8x256xf32>
    %196 = arith.addf %192, %195 : vector<8x256xf32>
    %c8_75 = arith.constant 8 : index
    %c0_76 = arith.constant 0 : index
    %c0_77 = arith.constant 0 : index
    %197 = vector.load %arg5[%c8_75, %c0_76, %c0_77] : memref<9x8x8xf32, #tpu.memory_space<vmem>>, vector<1x8x8xf32>
    %198 = vector.shape_cast %197 : vector<1x8x8xf32> to vector<8x8xf32>
    %cst_78 = arith.constant dense<0.000000e+00> : vector<8x256xf32>
    %199 = tpu.matmul %198, %188, %cst_78 {dimension_numbers = #tpu.dot_dimension_numbers<[1], [0], [0], [1], [0, 0, 1, 1], [], []>, precision = #tpu.contract_precision<fp32>} : vector<8x8xf32>, vector<8x256xf32>, vector<8x256xf32> -> vector<8x256xf32>
    %200 = arith.addf %196, %199 : vector<8x256xf32>
    %c0_79 = arith.constant 0 : index
    %c0_80 = arith.constant 0 : index
    %201 = vector.load %arg6[%c0_79, %c0_80] : memref<8x1xf32, #tpu.memory_space<vmem>>, vector<8x1xf32>
    %202 = vector.broadcast %201 : vector<8x1xf32> to vector<8x256xf32>
    %203 = arith.addf %200, %202 : vector<8x256xf32>
    %cst_81 = arith.constant dense<0.000000e+00> : vector<8xf32>
    %204 = vector.multi_reduction <add>, %203, %cst_81 [1] : vector<8x256xf32> to vector<8xf32>
    %205 = vector.shape_cast %204 : vector<8xf32> to vector<8x1xf32>
    %cst_82 = arith.constant 3.906250e-03 : f32
    %206 = vector.broadcast %cst_82 : f32 to vector<8x1xf32>
    %207 = arith.mulf %205, %206 : vector<8x1xf32>
    %208 = arith.mulf %203, %203 : vector<8x256xf32>
    %cst_83 = arith.constant dense<0.000000e+00> : vector<8xf32>
    %209 = vector.multi_reduction <add>, %208, %cst_83 [1] : vector<8x256xf32> to vector<8xf32>
    %210 = vector.shape_cast %209 : vector<8xf32> to vector<8x1xf32>
    %cst_84 = arith.constant 3.906250e-03 : f32
    %211 = vector.broadcast %cst_84 : f32 to vector<8x1xf32>
    %212 = arith.mulf %210, %211 : vector<8x1xf32>
    %213 = arith.mulf %207, %207 : vector<8x1xf32>
    %214 = arith.subf %212, %213 : vector<8x1xf32>
    %215 = vector.broadcast %207 : vector<8x1xf32> to vector<8x256xf32>
    %216 = arith.subf %203, %215 : vector<8x256xf32>
    %cst_85 = arith.constant 9.99999974E-6 : f32
    %217 = vector.broadcast %cst_85 : f32 to vector<8x1xf32>
    %218 = arith.addf %214, %217 : vector<8x1xf32>
    %219 = math.rsqrt %218 : vector<8x1xf32>
    %220 = vector.broadcast %219 : vector<8x1xf32> to vector<8x256xf32>
    %221 = arith.mulf %216, %220 : vector<8x256xf32>
    %222 = arith.addf %1, %221 : vector<8x256xf32>
    %c0_86 = arith.constant 0 : index
    %c0_87 = arith.constant 0 : index
    %c0_88 = arith.constant 0 : index
    %223 = vector.load %arg7[%c0_86, %c0_87, %c0_88] : memref<1x8x256xf32, #tpu.memory_space<vmem>>, vector<1x8x256xf32>
    %224 = vector.shape_cast %223 : vector<1x8x256xf32> to vector<8x256xf32>
    %225 = vector.shape_cast %222 : vector<8x256xf32> to vector<1x8x256xf32>
    tpu.vector_store %arg7[%c0_86, %c0_87, %c0_88], %225 {strides = array<i32>} : memref<1x8x256xf32, #tpu.memory_space<vmem>>, vector<1x8x256xf32>,
    return
  }
  func.func @transform_0(%arg0: i32) -> (i32, i32, i32) {
    %c0_i32 = arith.constant 0 : i32
    %c0_i32_0 = arith.constant 0 : i32
    %c0_i32_1 = arith.constant 0 : i32
    return %arg0, %c0_i32, %c0_i32_0 : i32, i32, i32
  }
  func.func @transform_1(%arg0: i32) -> (i32, i32) {
    %c0_i32 = arith.constant 0 : i32
    %c0_i32_0 = arith.constant 0 : i32
    %c0_i32_1 = arith.constant 0 : i32
    return %c0_i32, %c0_i32_0 : i32, i32
  }
  func.func @transform_2(%arg0: i32) -> (i32, i32, i32) {
    %c0_i32 = arith.constant 0 : i32
    %c0_i32_0 = arith.constant 0 : i32
    %c0_i32_1 = arith.constant 0 : i32
    %c0_i32_2 = arith.constant 0 : i32
    return %c0_i32, %c0_i32_0, %c0_i32_1 : i32, i32, i32
  }
  func.func @transform_3(%arg0: i32) -> (i32, i32) {
    %c0_i32 = arith.constant 0 : i32
    %c0_i32_0 = arith.constant 0 : i32
    %c0_i32_1 = arith.constant 0 : i32
    return %c0_i32, %c0_i32_0 : i32, i32
  }
  func.func @transform_4(%arg0: i32) -> (i32, i32, i32) {
    %c0_i32 = arith.constant 0 : i32
    %c0_i32_0 = arith.constant 0 : i32
    %c0_i32_1 = arith.constant 0 : i32
    %c0_i32_2 = arith.constant 0 : i32
    return %c0_i32, %c0_i32_0, %c0_i32_1 : i32, i32, i32
  }
  func.func @transform_5(%arg0: i32) -> (i32, i32) {
    %c0_i32 = arith.constant 0 : i32
    %c0_i32_0 = arith.constant 0 : i32
    %c0_i32_1 = arith.constant 0 : i32
    return %c0_i32, %c0_i32_0 : i32, i32
  }
  func.func @transform_6(%arg0: i32) -> (i32, i32, i32) {
    %c0_i32 = arith.constant 0 : i32
    %c0_i32_0 = arith.constant 0 : i32
    %c0_i32_1 = arith.constant 0 : i32
    return %arg0, %c0_i32, %c0_i32_0 : i32, i32, i32
  }
}

</mosaic_0001>

<bundles_post_ra>
// kernel: residual_block.1
= control target key start
LH: loop header
LB: loop body
LE: loop exit
PB: predicated region body
PF: predicated region fallthrough
CT: control target
= control target key end

     0   :  { %s9409_s21 = smov 0   ;;  %s10006_s0 = inlined_call_operand.vmem [shape: f32[2,8,256], index: 0, kind: input, shape index: {}]   ;;  %s10007_s1 = inlined_call_operand.vmem [shape: s32[2,256], index: 1, kind: input, shape index: {}]   ;;  %s10008_s2 = inlined_call_operand.vmem [shape: f32[9,8,8], index: 2, kind: input, shape index: {}]   ;;  %s10009_s3 = inlined_call_operand.vmem [shape: f32[8,1], index: 3, kind: input, shape index: {}]   ;;  %s10010_s4 = inlined_call_operand.vmem [shape: f32[9,8,8], index: 4, kind: input, shape index: {}]   ;;  %s10011_s5 = inlined_call_operand.vmem [shape: f32[8,1], index: 5, kind: input, shape index: {}]   ;;  %s10012_s6 = inlined_call_operand.vmem [shape: f32[2,8,256], index: 6, kind: output, shape index: {}]  }
   0x1 LB: > { %s9097_s22 = sadd.s32 4294967295, %s9366_s21   ;;  %p9101_p0 = scmp.ge.s32.totalorder %s9366_s21, 1  ;;  %s9366_s21 = sphi %s9409_s21, %s16_s21  }
   0x2   : > { %p212_p1 = scmp.lt.s32.totalorder %s9366_s21, 3 }
   0x4   : > { %p213_p2 = pnand %p9101_p0, %p212_p1 }
   0x5   : > { %p242_p3 = scmp.lt.s32.totalorder (!%p213_p2), %s9097_s22, 1  ;;  %v9368_v0 = vmov (!%p213_p2), 0   ;;  %v9369_v1 = vmov (!%p213_p2), 0.0   ;;  %s9370_s27 = smov (!%p213_p2), 16   ;;  %v9107_v4 = vld [vmem:[%s10008_s2 + $0x8] sm:$0xff] (!%p213_p2)  ;;  %vm360_vm0 = vcmask (!%p213_p2), 64512   ;;  %v284_v5 = vlaneseq (!%p213_p2) }
   0x6   : > { %216 = sbr.rel (%p213_p2) target bundleno = 2030 (0x7ee), region = 44  ;;  %9353 = vset.pattern.permute.xlu0 (!%p213_p2), %v9368_v0  ;;  %430 = vmatprep.mubr.f32.mxu0 (!%p213_p2), %v9369_v1  ;;  %s9371_s28 = smov (!%p213_p2), 112   ;;  %v362_v6 = vsel (!%p213_p2), %vm360_vm0, %v9107_v4, 0  ;;  %v254_v7 = vld [vmem:[%s10007_s1] ss:$2 sm:$0x3] (!%p213_p2) }
   0x7   : > { %4795 = vmatprep.mubr.f32.mxu1 (!%p213_p2), %v9369_v1  ;;  %v285_v8 = vshrl.u32 (!%p213_p2), %v284_v5, 7  ;;  %v9451_v9 = vand.u32 (!%p213_p2), 4294901760, %v362_v6  ;;  %vm257_vm1 = vcmp.eq.s32.totalorder (!%p213_p2), %v254_v7, 0  ;;  %vm278_vm2 = vcmask (!%p213_p2), 130048   ;;  %s9372_s9 = smov (!%p213_p2), 1   ;;  %s9373_s10 = smov (!%p213_p2), 127  }
   0x8   : > { %v283_v12 = vsel (!%p213_p2), %vm257_vm1, 1, %v9368_v0  ;;  %vm267_vm3 = vcmask (!%p213_p2), 916480   ;;  %vm258_vm6 = vcmp.eq.s32.totalorder (!%p213_p2), %v254_v7, 15  ;;  %v357_v48 = vld [vmem:[%s10008_s2] sm:$0xff] (!%p213_p2)  ;;  %vm316_vm11 = vcmask (!%p213_p2), 7168  }
   0x9   : > { %v9453_v10 = vsub.s32 (!%p213_p2), 1, %v285_v8  ;;  %v9455_v11 = vsub.s32 (!%p213_p2), 0, %v285_v8  ;;  %v9459_v13 = vsub.f32 (!%p213_p2), %v362_v6, %v9451_v9  ;;  %v296_v37 = vsel (!%p213_p2), %vm258_vm6, 1, %v9368_v0  ;;  %v9106_v50 = vld [vmem:[%s10007_s1 + $0x1] ss:$2 sm:$0x3] (!%p213_p2) }
   0xa   : > { %v830_v49 = vsel (!%p213_p2), %vm360_vm0, %v357_v48, 0  ;;  %vm259_vm9 = vcmp.eq.s32.totalorder (!%p213_p2), %v9106_v50, 0  ;;  %vm260_vm10 = vcmp.eq.s32.totalorder (!%p213_p2), %v9106_v50, 15  ;;  %vm325_vm12 = vcmask (!%p213_p2), 1039360   ;;  %v9012_v45 = vld [vmem:[%s10011_s5] sm:$0xff] (!%p213_p2) }
   0xb   : > { %v291_v14 = vrot.slane (!%p213_p2), %v283_v12, %v9453_v10  ;;  %v287_v15 = vrot.slane (!%p213_p2), %v283_v12, %v9455_v11  ;;  %v433_v18 = vand.u32 (!%p213_p2), 4294901760, %v9459_v13  ;;  %v304_v42 = vrot.slane (!%p213_p2), %v296_v37, %v9453_v10  ;;  %v4723_v44 = vld [vmem:[%s10010_s4] sm:$0xff] (!%p213_p2) }
   0xc   : > { %v300_v43 = vrot.slane (!%p213_p2), %v296_v37, %v9455_v11  ;;  %v9537_v51 = vand.u32 (!%p213_p2), 4294901760, %v830_v49  ;;  %v331_v53 = vsel (!%p213_p2), %vm259_vm9, 1, %v9368_v0  ;;  %v344_v63 = vsel (!%p213_p2), %vm260_vm10, 1, %v9368_v0 }
   0xd   : > { %s10030_s22 = smov (!%p242_p3, %s9097_s22), 1  ;;  %vm9464_vm4 = vcmp.eq.s32.totalorder %v291_v14, 1  ;;  %vm9468_vm5 = vcmp.eq.s32.totalorder %v287_v15, 1  ;;  %v434_v23 = vsub.f32 %v9459_v13, %v433_v18  ;;  %vm9497_vm7 = vcmp.eq.s32.totalorder %v304_v42, 1 }
   0xe   : > { %s9125_s23 = sshll.u32 %s10030_s22, 4  ;;  %vm9501_vm8 = vcmp.eq.s32.totalorder %v300_v43, 1  ;;  %v9540_v52 = vsub.f32 %v830_v49, %v9537_v51  ;;  %v335_v54 = vrot.slane %v331_v53, %v9455_v11  ;;  %v339_v55 = vrot.slane %v331_v53, %v9453_v10 }
   0xf   : > { %s9428_s26 = scalar_lea.vmem %s10006_s0, %s9125_s23  ;;  %v435_v32 = vand.u32 4294901760, %v434_v23  ;;  %v348_v15 = vrot.slane %v344_v63, %v9455_v11 }
  0x10   : > { %v9431_v2 = vld [vmem:[%s9428_s26 + $0x8] sm:$0xff]  ;;  %v9434_v3 = vld [vmem:[%s9428_s26] sm:$0xff]  ;;  %v901_v56 = vand.u32 4294901760, %v9540_v52  ;;  %vm9546_vm13 = vcmp.eq.s32.totalorder %v335_v54, 1  ;;  %vm9550_vm14 = vcmp.eq.s32.totalorder %v339_v55, 1  ;;  %v9108_v54 = vld [vmem:[%s10008_s2 + $0x10] sm:$0xff] }
  0x11   : > { %273 = vrot.lane.b32.xlu1 %v9431_v2, %s9370_s27  ;;  %263 = vrot.lane.b32.xlu0 %v9434_v3, %s9371_s28  ;;  %vm9584_vm15 = vcmp.eq.s32.totalorder %v348_v15, 1  ;;  %v9109_v15 = vld [vmem:[%s10008_s2 + $0x18] sm:$0xff] }
  0x12   : > { %v902_v61 = vsub.f32 %v9540_v52, %v901_v56 }
  0x14   : > { %v903_v14 = vand.u32 4294901760, %v902_v61 }
  0x15   : > { %276 = vrot.lane.b32.xlu1 %v9434_v3, %s9370_s27  ;;  %265 = vrot.lane.b32.xlu0 %v9431_v2, %s9371_s28 }
  0x83   : > { %v274_v16 = vpop.permute.xlu1 %273  ;;  %v264_v17 = vpop.permute.xlu0 %263 }
  0x87   : > { %v277_v21 = vpop.permute.xlu1 %276  ;;  %v266_v22 = vpop.permute.xlu0 %265 }
  0x88   : > { %v279_v24 = vsel %vm278_vm2, %v277_v21, %v274_v16  ;;  %v282_v25 = vsel %vm278_vm2, %v274_v16, %v277_v21  ;;  %v268_v26 = vsel %vm267_vm3, %v264_v17, %v266_v22  ;;  %v272_v27 = vsel %vm267_vm3, %v266_v22, %v264_v17 }
  0x89   : > { %v295_v28 = vsel %vm9464_vm4, %v272_v27, %v279_v24  ;;  %v294_v29 = vsel %vm9468_vm5, %v268_v26, %v282_v25  ;;  %v9509_v46 = vsel %vm9497_vm7, %v279_v24, %v272_v27  ;;  %v9513_v47 = vsel %vm9501_vm8, %v282_v25, %v268_v26 }
  0x8a   : > { %310 = vrot.lane.b32.xlu0 %v295_v28, %s9372_s9  ;;  %v364_v30 = vand.u32 4294901760, %v295_v28  ;;  %314 = vrot.lane.b32.xlu1 %v294_v29, %s9372_s9  ;;  %v366_v31 = vand.u32 4294901760, %v294_v29  ;;  %v352_v16 = vrot.slane %v344_v63, %v9453_v10 }
  0x8c   : > { %v443_v33 = vsub.f32 %v295_v28, %v364_v30  ;;  %v449_v34 = vsub.f32 %v294_v29, %v366_v31  ;;  %365 = vmatprep.subr.mxu0 %v364_v30  ;;  %vm9588_vm1 = vcmp.eq.s32.totalorder %v352_v16, 1  ;;  %v1794_v16 = vsel %vm360_vm0, %v9109_v15, 0 }
  0x8d   : > { %367 = vmatpush1.msra.mxu0 %v366_v31 }
  0x8e   : > { %321 = vrot.lane.b32.xlu0 %v294_v29, %s9373_s10  ;;  %323 = vrot.lane.b32.xlu1 %v295_v28, %s9373_s10  ;;  %v444_v35 = vand.u32 4294901760, %v443_v33  ;;  %v450_v36 = vand.u32 4294901760, %v449_v34 }
  0x8f   : > { %436 = vmatmul.mubr.f32.vlgmr.msra.gmra.mrb[0].mxu0 %v435_v32 }
  0x90   : > { %v445_v38 = vsub.f32 %v443_v33, %v444_v35  ;;  %v451_v39 = vsub.f32 %v449_v34, %v450_v36  ;;  %516 = vmatprep.mubr.f32.mxu0 %v9369_v1 }
  0x92   : > { %1769 = vrot.lane.b32.xlu0 %v9431_v2, %s9372_s9  ;;  %1772 = vrot.lane.b32.xlu1 %v9434_v3, %s9372_s9  ;;  %v446_v40 = vand.u32 4294901760, %v445_v38  ;;  %v452_v41 = vand.u32 4294901760, %v451_v39 }
  0x94   : > { %447 = vmatprep.subr.mxu0 %v446_v40 }
  0x95   : > { %453 = vmatpush1.msra.mxu0 %v452_v41 }
  0x96   : > { %1778 = vrot.lane.b32.xlu0 %v9434_v3, %s9373_s10  ;;  %1780 = vrot.lane.b32.xlu1 %v9431_v2, %s9373_s10 }
  0x97   : > { %518 = vmatmul.mubr.f32.vlgmr.msra.gmra.mrb[0].mxu0 %v9451_v9  ;;  %526 = vmatprep.subr.mxu0 %v443_v33 }
  0x98   : > { %529 = vmatpush1.msra.mxu0 %v449_v34  ;;  %592 = vmatprep.mubr.f32.mxu0 %v9369_v1 }
  0x99   : > { %602 = vmatprep.subr.mxu0 %v364_v30 }
  0x9a   : > { %3208 = vrot.lane.b32.xlu0 %v9509_v46, %s9372_s9  ;;  %3212 = vrot.lane.b32.xlu1 %v9513_v47, %s9372_s9 }
  0x9e   : > { %3218 = vrot.lane.b32.xlu0 %v9513_v47, %s9373_s10  ;;  %3220 = vrot.lane.b32.xlu1 %v9509_v46, %s9373_s10 }
  0x9f   : > { %595 = vmatmul.mubr.f32.vlgmr.msra.gmra.mrb[0].mxu0 %v9459_v13 }
  0xa0   : > { %604 = vmatpush1.msra.mxu0 %v366_v31  ;;  %667 = vmatprep.mubr.f32.mxu0 %v9369_v1 }
  0xa1   : > { %680 = vmatprep.subr.mxu0 %v444_v35 }
  0xa7   : > { %671 = vmatmul.mubr.f32.vlgmr.msra.gmra.mrb[0].mxu0 %v433_v18 }
  0xa8   : > { %684 = vmatpush1.msra.mxu0 %v450_v36  ;;  %747 = vmatprep.mubr.f32.mxu0 %v9369_v1 }
  0xa9   : > { %756 = vmatprep.subr.mxu0 %v364_v30 }
  0xaf   : > { %749 = vmatmul.mubr.f32.vlgmr.msra.gmra.mrb[0].mxu0 %v9451_v9 }
  0xb0   : > { %758 = vmatpush1.msra.mxu0 %v366_v31  ;;  %821 = vmatprep.mubr.f32.mxu0 %v9369_v1 }
  0xb7   : > { %823 = vmatmul.mubr.f32.vlgmr.msra.gmra.mrb[0].mxu0 %v9451_v9 }
  0xb8   : > { %898 = vmatprep.mubr.f32.mxu0 %v9369_v1 }
  0xfc   : > { %v311_v57 = vpop.permute.xlu0 %310  ;;  %v315_v58 = vpop.permute.xlu1 %314 }
  0xfd   : > { %v317_v5 = vsel %vm316_vm11, %v315_v58, %v311_v57  ;;  %v9560_v6 = vsel %vm316_vm11, %v311_v57, %v315_v58  ;;  %v1300_v57 = vsel %vm360_vm0, %v9108_v54, 0 }
 0x100   : > { %v322_v62 = vpop.permute.xlu0 %321  ;;  %v324_v4 = vpop.permute.xlu1 %323 }
 0x101   : > { %v9563_v7 = vsel %vm325_vm12, %v322_v62, %v324_v4  ;;  %v330_v8 = vsel %vm325_vm12, %v324_v4, %v322_v62  ;;  %v1369_v62 = vand.u32 4294901760, %v1300_v57 }
 0x102   : > { %v342_v9 = vsel %vm9546_vm13, %v9563_v7, %v9560_v6  ;;  %v343_v12 = vsel %vm9550_vm14, %v330_v8, %v317_v5  ;;  %v356_v53 = vsel %vm9588_vm1, %v317_v5, %v330_v8  ;;  %v355_v58 = vsel %vm9584_vm15, %v9560_v6, %v9563_v7 }
 0x103   : > { %v832_v0 = vand.u32 4294901760, %v343_v12  ;;  %v9572_v13 = vand.u32 4294901760, %v342_v9  ;;  %v1302_v55 = vand.u32 4294901760, %v356_v53  ;;  %v1304_v63 = vand.u32 4294901760, %v355_v58 }
 0x104   : > { %v1770_v17 = vpop.permute.xlu0 %1769  ;;  %v1773_v18 = vpop.permute.xlu1 %1772  ;;  %v1370_v5 = vsub.f32 %v1300_v57, %v1369_v62 }
 0x105   : > { %v911_v21 = vsub.f32 %v343_v12, %v832_v0  ;;  %v917_v22 = vsub.f32 %v342_v9, %v9572_v13  ;;  %833 = vmatprep.subr.mxu0 %v832_v0  ;;  %v9579_v24 = vsel %vm316_vm11, %v1773_v18, %v1770_v17  ;;  %v9582_v25 = vsel %vm316_vm11, %v1770_v17, %v1773_v18 }
 0x106   : > { %835 = vmatpush1.msra.mxu0 %v9572_v13  ;;  %v1381_v61 = vsub.f32 %v356_v53, %v1302_v55  ;;  %v1371_v8 = vand.u32 4294901760, %v1370_v5  ;;  %v2270_v53 = vand.u32 4294901760, %v9434_v3 }
 0x107   : > { %v918_v23 = vand.u32 4294901760, %v917_v22  ;;  %904 = vmatmul.mubr.f32.vlgmr.msra.gmra.mrb[0].mxu0 %v903_v14  ;;  %v912_v26 = vand.u32 4294901760, %v911_v21 }
 0x108   : > { %v1779_v27 = vpop.permute.xlu0 %1778  ;;  %v1781_v28 = vpop.permute.xlu1 %1780  ;;  %984 = vmatprep.mubr.f32.mxu0 %v9369_v1  ;;  %v1382_v4 = vand.u32 4294901760, %v1381_v61  ;;  %v1372_v6 = vsub.f32 %v1370_v5, %v1371_v8  ;;  %v2353_v57 = vsub.f32 %v9434_v3, %v2270_v53  ;;  %v9111_v3 = vld [vmem:[%s10008_s2 + $0x28] sm:$0xff] }
 0x109   : > { %v9594_v29 = vsel %vm325_vm12, %v1779_v27, %v1781_v28  ;;  %v9597_v30 = vsel %vm325_vm12, %v1781_v28, %v1779_v27  ;;  %v913_v31 = vsub.f32 %v911_v21, %v912_v26  ;;  %v919_v32 = vsub.f32 %v917_v22, %v918_v23 }
 0x10a   : > { %v9603_v33 = vsel %vm9584_vm15, %v9582_v25, %v9594_v29  ;;  %v9609_v34 = vsel %vm9588_vm1, %v9579_v24, %v9597_v30  ;;  %v1787_v18 = vsel %vm9546_vm13, %v9594_v29, %v9582_v25 }
 0x10b   : > { %v914_v37 = vand.u32 4294901760, %v913_v31  ;;  %v920_v38 = vand.u32 4294901760, %v919_v32 }
 0x10c   : > { %v3209_v35 = vpop.permute.xlu0 %3208  ;;  %v3213_v36 = vpop.permute.xlu1 %3212 }
 0x10d   : > { %915 = vmatprep.subr.mxu0 %v914_v37  ;;  %v9612_v39 = vsel %vm316_vm11, %v3213_v36, %v3209_v35  ;;  %v9616_v42 = vsel %vm316_vm11, %v3209_v35, %v3213_v36  ;;  %v2268_v36 = vand.u32 4294901760, %v9431_v2  ;;  %v9110_v37 = vld [vmem:[%s10008_s2 + $0x20] sm:$0xff] }
 0x10e   : > { %921 = vmatpush1.msra.mxu0 %v920_v38  ;;  %v2266_v38 = vsel %vm360_vm0, %v9110_v37, 0 }
 0x10f   : > { %986 = vmatmul.mubr.f32.vlgmr.msra.gmra.mrb[0].mxu0 %v9537_v51  ;;  %994 = vmatprep.subr.mxu0 %v911_v21  ;;  %v1863_v21 = vand.u32 4294901760, %v1794_v16 }
 0x110   : > { %v3219_v40 = vpop.permute.xlu0 %3218  ;;  %v3221_v41 = vpop.permute.xlu1 %3220  ;;  %997 = vmatpush1.msra.mxu0 %v917_v22  ;;  %1060 = vmatprep.mubr.f32.mxu0 %v9369_v1 }
 0x111   : > { %v9619_v43 = vsel %vm325_vm12, %v3219_v40, %v3221_v41  ;;  %v9622_v48 = vsel %vm325_vm12, %v3221_v41, %v3219_v40  ;;  %1070 = vmatprep.subr.mxu0 %v832_v0  ;;  %v2347_v40 = vsub.f32 %v9431_v2, %v2268_v36  ;;  %v2335_v41 = vand.u32 4294901760, %v2266_v38 }
 0x112   : > { %v9629_v49 = vsel %vm9584_vm15, %v9616_v42, %v9619_v43  ;;  %v9635_v50 = vsel %vm9588_vm1, %v9612_v39, %v9622_v48 }
 0x113   : > { %v2348_v54 = vand.u32 4294901760, %v2347_v40 }
 0x117   : > { %1063 = vmatmul.mubr.f32.vlgmr.msra.gmra.mrb[0].mxu0 %v9540_v52  ;;  %v1387_v52 = vsub.f32 %v355_v58, %v1304_v63  ;;  %v2349_v58 = vsub.f32 %v2347_v40, %v2348_v54 }
 0x118   : > { %1072 = vmatpush1.msra.mxu0 %v9572_v13  ;;  %1135 = vmatprep.mubr.f32.mxu0 %v9369_v1 }
 0x119   : > { %1148 = vmatprep.subr.mxu0 %v912_v26  ;;  %v1388_v9 = vand.u32 4294901760, %v1387_v52 }
 0x11b   : > { %v1389_v7 = vsub.f32 %v1387_v52, %v1388_v9 }
 0x11d   : > { %v1390_v14 = vand.u32 4294901760, %v1389_v7 }
 0x11f   : > { %1139 = vmatmul.mubr.f32.vlgmr.msra.gmra.mrb[0].mxu0 %v901_v56  ;;  %v1383_v56 = vsub.f32 %v1381_v61, %v1382_v4 }
 0x120   : > { %1152 = vmatpush1.msra.mxu0 %v918_v23  ;;  %1215 = vmatprep.mubr.f32.mxu0 %v9369_v1  ;;  %v1798_v23 = vand.u32 4294901760, %v1787_v18 }
 0x121   : > { %1224 = vmatprep.subr.mxu0 %v832_v0  ;;  %v1384_v12 = vand.u32 4294901760, %v1383_v56  ;;  %v1373_v0 = vand.u32 4294901760, %v1372_v6  ;;  %v2740_v56 = vand.u32 4294901760, %v9609_v34  ;;  %v2742_v6 = vand.u32 4294901760, %v9603_v33 }
 0x122   : > { %v1881_v27 = vsub.f32 %v1787_v18, %v1798_v23 }
 0x124   : > { %v1882_v31 = vand.u32 4294901760, %v1881_v27 }
 0x126   : > { %v1883_v25 = vsub.f32 %v1881_v27, %v1882_v31 }
 0x127   : > { %1217 = vmatmul.mubr.f32.vlgmr.msra.gmra.mrb[0].mxu0 %v9537_v51 }
 0x128   : > { %1226 = vmatpush1.msra.mxu0 %v9572_v13  ;;  %1289 = vmatprep.mubr.f32.mxu0 %v9369_v1  ;;  %v1884_v35 = vand.u32 4294901760, %v1883_v25 }
 0x129   : > { %1303 = vmatprep.subr.mxu0 %v1302_v55 }
 0x12f   : > { %1291 = vmatmul.mubr.f32.vlgmr.msra.gmra.mrb[0].mxu0 %v9537_v51  ;;  %v1788_v51 = vsel %vm9550_vm14, %v9597_v30, %v9579_v24  ;;  %v1864_v24 = vsub.f32 %v1794_v16, %v1863_v21 }
 0x130   : > { %1305 = vmatpush1.msra.mxu0 %v1304_v63  ;;  %1368 = vmatprep.mubr.f32.mxu0 %v9369_v1  ;;  %v1796_v13 = vand.u32 4294901760, %v1788_v51 }
 0x131   : > { %1385 = vmatprep.subr.mxu0 %v1384_v12  ;;  %v1865_v28 = vand.u32 4294901760, %v1864_v24 }
 0x132   : > { %v1875_v17 = vsub.f32 %v1788_v51, %v1796_v13 }
 0x133   : > { %v1866_v32 = vsub.f32 %v1864_v24, %v1865_v28 }
 0x134   : > { %v1876_v22 = vand.u32 4294901760, %v1875_v17 }
 0x135   : > { %v1867_v29 = vand.u32 4294901760, %v1866_v32 }
 0x136   : > { %v1877_v26 = vsub.f32 %v1875_v17, %v1876_v22 }
 0x137   : > { %1374 = vmatmul.mubr.f32.vlgmr.msra.gmra.mrb[0].mxu0 %v1373_v0 }
 0x138   : > { %1391 = vmatpush1.msra.mxu0 %v1390_v14  ;;  %1454 = vmatprep.mubr.f32.mxu0 %v9369_v1  ;;  %v1878_v30 = vand.u32 4294901760, %v1877_v26  ;;  %v2825_v14 = vsub.f32 %v9603_v33, %v2742_v6  ;;  %v3228_v33 = vsel %vm9550_vm14, %v9622_v48, %v9612_v39  ;;  %v3227_v26 = vsel %vm9546_vm13, %v9619_v43, %v9616_v42 }
 0x139   : > { %1464 = vmatprep.subr.mxu0 %v1381_v61  ;;  %v3238_v39 = vand.u32 4294901760, %v3227_v26 }
 0x13a   : > { %v2826_v15 = vand.u32 4294901760, %v2825_v14 }
 0x13f   : > { %1456 = vmatmul.mubr.f32.vlgmr.msra.gmra.mrb[0].mxu0 %v1369_v62 }
 0x140   : > { %1467 = vmatpush1.msra.mxu0 %v1387_v52  ;;  %1530 = vmatprep.mubr.f32.mxu0 %v9369_v1 }
 0x141   : > { %1540 = vmatprep.subr.mxu0 %v1302_v55 }
 0x147   : > { %1533 = vmatmul.mubr.f32.vlgmr.msra.gmra.mrb[0].mxu0 %v1370_v5 }
 0x148   : > { %1542 = vmatpush1.msra.mxu0 %v1304_v63  ;;  %1605 = vmatprep.mubr.f32.mxu0 %v9369_v1 }
 0x149   : > { %1618 = vmatprep.subr.mxu0 %v1382_v4 }
 0x14f   : > { %1609 = vmatmul.mubr.f32.vlgmr.msra.gmra.mrb[0].mxu0 %v1371_v8  ;;  %v2738_v8 = vsel %vm360_vm0, %v9111_v3, 0 }
 0x150   : > { %1622 = vmatpush1.msra.mxu0 %v1388_v9  ;;  %1685 = vmatprep.mubr.f32.mxu0 %v9369_v1  ;;  %v2819_v9 = vsub.f32 %v9609_v34, %v2740_v56  ;;  %v2807_v12 = vand.u32 4294901760, %v2738_v8  ;;  %v2827_v34 = vsub.f32 %v2825_v14, %v2826_v15 }
 0x151   : > { %1694 = vmatprep.subr.mxu0 %v1302_v55  ;;  %v2336_v55 = vsub.f32 %v2266_v38, %v2335_v41  ;;  %v4647_v38 = vld [vmem:[%s10009_s3] sm:$0xff] }
 0x152   : > { %v2820_v7 = vand.u32 4294901760, %v2819_v9  ;;  %v2808_v0 = vsub.f32 %v2738_v8, %v2807_v12  ;;  %4650 = vperm.xlu0 %9353, %v4647_v38   ;;  %v4180_v8 = vand.u32 4294901760, %v9635_v50 }
 0x153   : > { %v2337_v61 = vand.u32 4294901760, %v2336_v55 }
 0x154   : > { %v2821_v51 = vsub.f32 %v2819_v9, %v2820_v7 }
 0x155   : > { %v2338_v4 = vsub.f32 %v2336_v55, %v2337_v61 }
 0x156   : > { %v2822_v16 = vand.u32 4294901760, %v2821_v51 }
 0x157   : > { %1687 = vmatmul.mubr.f32.vlgmr.msra.gmra.mrb[0].mxu0 %v1369_v62  ;;  %v2339_v5 = vand.u32 4294901760, %v2338_v4 }
 0x158   : > { %1696 = vmatpush1.msra.mxu0 %v1304_v63  ;;  %1759 = vmatprep.mubr.f32.mxu0 %v9369_v1  ;;  %v2350_v63 = vand.u32 4294901760, %v2349_v58 }
 0x159   : > { %1797 = vmatprep.subr.mxu0 %v1796_v13 }
 0x15f   : > { %1761 = vmatmul.mubr.f32.vlgmr.msra.gmra.mrb[0].mxu0 %v1369_v62  ;;  %v2354_v62 = vand.u32 4294901760, %v2353_v57 }
 0x160   : > { %1799 = vmatpush1.msra.mxu0 %v1798_v23  ;;  %1862 = vmatprep.mubr.f32.mxu0 %v9369_v1 }
 0x161   : > { %1879 = vmatprep.subr.mxu0 %v1878_v30  ;;  %v2355_v2 = vsub.f32 %v2353_v57, %v2354_v62 }
 0x163   : > { %v2356_v52 = vand.u32 4294901760, %v2355_v2 }
 0x167   : > { %1868 = vmatmul.mubr.f32.vlgmr.msra.gmra.mrb[0].mxu0 %v1867_v29 }
 0x168   : > { %1885 = vmatpush1.msra.mxu0 %v1884_v35  ;;  %1948 = vmatprep.mubr.f32.mxu0 %v9369_v1 }
 0x169   : > { %1958 = vmatprep.subr.mxu0 %v1875_v17 }
 0x16f   : > { %1950 = vmatmul.mubr.f32.vlgmr.msra.gmra.mrb[0].mxu0 %v1863_v21 }
 0x170   : > { %1961 = vmatpush1.msra.mxu0 %v1881_v27  ;;  %2024 = vmatprep.mubr.f32.mxu0 %v9369_v1 }
 0x171   : > { %2034 = vmatprep.subr.mxu0 %v1796_v13 }
 0x177   : > { %2027 = vmatmul.mubr.f32.vlgmr.msra.gmra.mrb[0].mxu0 %v1864_v24 }
 0x178   : > { %2036 = vmatpush1.msra.mxu0 %v1798_v23  ;;  %2099 = vmatprep.mubr.f32.mxu0 %v9369_v1 }
 0x179   : > { %2112 = vmatprep.subr.mxu0 %v1876_v22  ;;  %v9112_v22 = vld [vmem:[%s10008_s2 + $0x30] sm:$0xff] }
 0x17a   : > { %v3234_v24 = vsel %vm360_vm0, %v9112_v22, 0 }
 0x17f   : > { %2103 = vmatmul.mubr.f32.vlgmr.msra.gmra.mrb[0].mxu0 %v1865_v28  ;;  %v3303_v28 = vand.u32 4294901760, %v3234_v24 }
 0x180   : > { %2116 = vmatpush1.msra.mxu0 %v1882_v31  ;;  %2179 = vmatprep.mubr.f32.mxu0 %v9369_v1  ;;  %v3321_v31 = vsub.f32 %v3227_v26, %v3238_v39 }
 0x181   : > { %2188 = vmatprep.subr.mxu0 %v1796_v13  ;;  %v2809_v13 = vand.u32 4294901760, %v2808_v0  ;;  %v3304_v30 = vsub.f32 %v3234_v24, %v3303_v28 }
 0x182   : > { %v3322_v29 = vand.u32 4294901760, %v3321_v31 }
 0x183   : > { %v2810_v17 = vsub.f32 %v2808_v0, %v2809_v13  ;;  %v3305_v25 = vand.u32 4294901760, %v3304_v30 }
 0x184   : > { %v3323_v42 = vsub.f32 %v3321_v31, %v3322_v29 }
 0x185   : > { %v2811_v18 = vand.u32 4294901760, %v2810_v17 }
 0x186   : > { %v3324_v37 = vand.u32 4294901760, %v3323_v42 }
 0x187   : > { %2181 = vmatmul.mubr.f32.vlgmr.msra.gmra.mrb[0].mxu0 %v1863_v21 }
 0x188   : > { %2190 = vmatpush1.msra.mxu0 %v1798_v23  ;;  %2253 = vmatprep.mubr.f32.mxu0 %v9369_v1  ;;  %v3236_v23 = vand.u32 4294901760, %v3228_v33 }
 0x189   : > { %2269 = vmatprep.subr.mxu0 %v2268_v36 }
 0x18a   : > { %v3315_v27 = vsub.f32 %v3228_v33, %v3236_v23 }
 0x18c   : > { %v3316_v48 = vand.u32 4294901760, %v3315_v27 }
 0x18e   : > { %v3317_v32 = vsub.f32 %v3315_v27, %v3316_v48 }
 0x18f   : > { %2255 = vmatmul.mubr.f32.vlgmr.msra.gmra.mrb[0].mxu0 %v1863_v21  ;;  %v2828_v21 = vand.u32 4294901760, %v2827_v34 }
 0x190   : > { %2271 = vmatpush1.msra.mxu0 %v2270_v53  ;;  %2334 = vmatprep.mubr.f32.mxu0 %v9369_v1  ;;  %v3318_v35 = vand.u32 4294901760, %v3317_v32 }
 0x191   : > { %2351 = vmatprep.subr.mxu0 %v2350_v63 }
 0x197   : > { %2340 = vmatmul.mubr.f32.vlgmr.msra.gmra.mrb[0].mxu0 %v2339_v5 }
 0x198   : > { %2357 = vmatpush1.msra.mxu0 %v2356_v52  ;;  %2420 = vmatprep.mubr.f32.mxu0 %v9369_v1 }
 0x199   : > { %2430 = vmatprep.subr.mxu0 %v2347_v40  ;;  %v9113_v40 = vld [vmem:[%s10008_s2 + $0x38] sm:$0xff] }
 0x19f   : > { %2422 = vmatmul.mubr.f32.vlgmr.msra.gmra.mrb[0].mxu0 %v2335_v41 }
 0x1a0   : > { %2433 = vmatpush1.msra.mxu0 %v2353_v57  ;;  %2496 = vmatprep.mubr.f32.mxu0 %v9369_v1  ;;  %v3710_v57 = vand.u32 4294901760, %v9513_v47 }
 0x1a1   : > { %2506 = vmatprep.subr.mxu0 %v2268_v36 }
 0x1a7   : > { %2499 = vmatmul.mubr.f32.vlgmr.msra.gmra.mrb[0].mxu0 %v2336_v55 }
 0x1a8   : > { %2508 = vmatpush1.msra.mxu0 %v2270_v53  ;;  %2571 = vmatprep.mubr.f32.mxu0 %v9369_v1 }
 0x1a9   : > { %2584 = vmatprep.subr.mxu0 %v2348_v54 }
 0x1af   : > { %2575 = vmatmul.mubr.f32.vlgmr.msra.gmra.mrb[0].mxu0 %v2337_v61 }
 0x1b0   : > { %2588 = vmatpush1.msra.mxu0 %v2354_v62  ;;  %2651 = vmatprep.mubr.f32.mxu0 %v9369_v1  ;;  %v3793_v62 = vsub.f32 %v9513_v47, %v3710_v57  ;;  %v9114_v47 = vld [vmem:[%s10008_s2 + $0x40] sm:$0xff] }
 0x1b1   : > { %2660 = vmatprep.subr.mxu0 %v2268_v36  ;;  %v3306_v36 = vsub.f32 %v3304_v30, %v3305_v25 }
 0x1b2   : > { %v3794_v2 = vand.u32 4294901760, %v3793_v62 }
 0x1b3   : > { %v3307_v43 = vand.u32 4294901760, %v3306_v36 }
 0x1b7   : > { %2653 = vmatmul.mubr.f32.vlgmr.msra.gmra.mrb[0].mxu0 %v2335_v41 }
 0x1b8   : > { %2662 = vmatpush1.msra.mxu0 %v2270_v53  ;;  %2725 = vmatprep.mubr.f32.mxu0 %v9369_v1  ;;  %v3706_v53 = vsel %vm360_vm0, %v9113_v40, 0 }
 0x1b9   : > { %2741 = vmatprep.subr.mxu0 %v2740_v56  ;;  %v3775_v55 = vand.u32 4294901760, %v3706_v53 }
 0x1bb   : > { %v3776_v61 = vsub.f32 %v3706_v53, %v3775_v55  ;;  %v9115_v53 = vld [vmem:[%s10010_s4 + $0x8] sm:$0xff] }
 0x1bd   : > { %v3777_v4 = vand.u32 4294901760, %v3776_v61 }
 0x1bf   : > { %2727 = vmatmul.mubr.f32.vlgmr.msra.gmra.mrb[0].mxu0 %v2335_v41  ;;  %v3708_v41 = vand.u32 4294901760, %v9509_v46  ;;  %v3778_v52 = vsub.f32 %v3776_v61, %v3777_v4 }
 0x1c0   : > { %2743 = vmatpush1.msra.mxu0 %v2742_v6  ;;  %2806 = vmatprep.mubr.f32.mxu0 %v9369_v1 }
 0x1c1   : > { %2823 = vmatprep.subr.mxu0 %v2822_v16  ;;  %v3787_v54 = vsub.f32 %v9509_v46, %v3708_v41  ;;  %v3795_v46 = vsub.f32 %v3793_v62, %v3794_v2  ;;  %v3779_v3 = vand.u32 4294901760, %v3778_v52 }
 0x1c3   : > { %v3788_v58 = vand.u32 4294901760, %v3787_v54 }
 0x1c5   : > { %v3789_v63 = vsub.f32 %v3787_v54, %v3788_v58 }
 0x1c7   : > { %2812 = vmatmul.mubr.f32.vlgmr.msra.gmra.mrb[0].mxu0 %v2811_v18  ;;  %v3790_v5 = vand.u32 4294901760, %v3789_v63 }
 0x1c8   : > { %2829 = vmatpush1.msra.mxu0 %v2828_v21  ;;  %2892 = vmatprep.mubr.f32.mxu0 %v9369_v1 }
 0x1c9   : > { %2902 = vmatprep.subr.mxu0 %v2819_v9  ;;  %v4178_v9 = vsel %vm360_vm0, %v9114_v47, 0 }
 0x1cf   : > { %2894 = vmatmul.mubr.f32.vlgmr.msra.gmra.mrb[0].mxu0 %v2807_v12 }
 0x1d0   : > { %2905 = vmatpush1.msra.mxu0 %v2825_v14  ;;  %2968 = vmatprep.mubr.f32.mxu0 %v9369_v1 }
 0x1d1   : > { %2978 = vmatprep.subr.mxu0 %v2740_v56 }
 0x1d7   : > { %2971 = vmatmul.mubr.f32.vlgmr.msra.gmra.mrb[0].mxu0 %v2808_v0 }
 0x1d8   : > { %2980 = vmatpush1.msra.mxu0 %v2742_v6  ;;  %3043 = vmatprep.mubr.f32.mxu0 %v9369_v1 }
 0x1d9   : > { %3056 = vmatprep.subr.mxu0 %v2820_v7  ;;  %v4182_v7 = vand.u32 4294901760, %v9629_v49 }
 0x1db   : > { %v4265_v51 = vsub.f32 %v9629_v49, %v4182_v7  ;;  %v4651_v49 = vpop.permute.xlu0 %4650 }
 0x1dd   : > { %v4266_v16 = vand.u32 4294901760, %v4265_v51 }
 0x1df   : > { %3047 = vmatmul.mubr.f32.vlgmr.msra.gmra.mrb[0].mxu0 %v2809_v13 }
 0x1e0   : > { %3060 = vmatpush1.msra.mxu0 %v2826_v15  ;;  %3123 = vmatprep.mubr.f32.mxu0 %v9369_v1 }
 0x1e1   : > { %3132 = vmatprep.subr.mxu0 %v2740_v56  ;;  %v3796_v56 = vand.u32 4294901760, %v3795_v46 }
 0x1e7   : > { %3125 = vmatmul.mubr.f32.vlgmr.msra.gmra.mrb[0].mxu0 %v2807_v12 }
 0x1e8   : > { %3134 = vmatpush1.msra.mxu0 %v2742_v6  ;;  %3197 = vmatprep.mubr.f32.mxu0 %v9369_v1  ;;  %v4247_v6 = vand.u32 4294901760, %v4178_v9 }
 0x1e9   : > { %3237 = vmatprep.subr.mxu0 %v3236_v23 }
 0x1ea   : > { %v4248_v14 = vsub.f32 %v4178_v9, %v4247_v6 }
 0x1ec   : > { %v4249_v15 = vand.u32 4294901760, %v4248_v14 }
 0x1ee   : > { %v4250_v34 = vsub.f32 %v4248_v14, %v4249_v15 }
 0x1ef   : > { %3199 = vmatmul.mubr.f32.vlgmr.msra.gmra.mrb[0].mxu0 %v2807_v12  ;;  %v4259_v12 = vsub.f32 %v9635_v50, %v4180_v8  ;;  %v4267_v50 = vsub.f32 %v4265_v51, %v4266_v16 }
 0x1f0   : > { %3239 = vmatpush1.msra.mxu0 %v3238_v39  ;;  %3302 = vmatprep.mubr.f32.mxu0 %v9369_v1  ;;  %v4251_v18 = vand.u32 4294901760, %v4250_v34 }
 0x1f1   : > { %3319 = vmatprep.subr.mxu0 %v3318_v35  ;;  %v4260_v0 = vand.u32 4294901760, %v4259_v12  ;;  %v4268_v21 = vand.u32 4294901760, %v4267_v50 }
 0x1f3   : > { %v4261_v13 = vsub.f32 %v4259_v12, %v4260_v0 }
 0x1f5   : > { %v4262_v17 = vand.u32 4294901760, %v4261_v13 }
 0x1f7   : > { %3308 = vmatmul.mubr.f32.vlgmr.msra.gmra.mrb[0].mxu0 %v3307_v43 }
 0x1f8   : > { %3325 = vmatpush1.msra.mxu0 %v3324_v37  ;;  %3388 = vmatprep.mubr.f32.mxu0 %v9369_v1 }
 0x1f9   : > { %3398 = vmatprep.subr.mxu0 %v3315_v27 }
 0x1ff   : > { %3390 = vmatmul.mubr.f32.vlgmr.msra.gmra.mrb[0].mxu0 %v3303_v28 }
 0x200   : > { %3401 = vmatpush1.msra.mxu0 %v3321_v31  ;;  %3464 = vmatprep.mubr.f32.mxu0 %v9369_v1 }
 0x201   : > { %3474 = vmatprep.subr.mxu0 %v3236_v23 }
 0x207   : > { %3467 = vmatmul.mubr.f32.vlgmr.msra.gmra.mrb[0].mxu0 %v3304_v30 }
 0x208   : > { %3476 = vmatpush1.msra.mxu0 %v3238_v39  ;;  %3539 = vmatprep.mubr.f32.mxu0 %v9369_v1 }
 0x209   : > { %3552 = vmatprep.subr.mxu0 %v3316_v48 }
 0x20f   : > { %3543 = vmatmul.mubr.f32.vlgmr.msra.gmra.mrb[0].mxu0 %v3305_v25 }
 0x210   : > { %3556 = vmatpush1.msra.mxu0 %v3322_v29  ;;  %3619 = vmatprep.mubr.f32.mxu0 %v9369_v1 }
 0x211   : > { %3628 = vmatprep.subr.mxu0 %v3236_v23 }
 0x217   : > { %3621 = vmatmul.mubr.f32.vlgmr.msra.gmra.mrb[0].mxu0 %v3303_v28 }
 0x218   : > { %3630 = vmatpush1.msra.mxu0 %v3238_v39  ;;  %3693 = vmatprep.mubr.f32.mxu0 %v9369_v1 }
 0x219   : > { %3709 = vmatprep.subr.mxu0 %v3708_v41 }
 0x21f   : > { %3695 = vmatmul.mubr.f32.vlgmr.msra.gmra.mrb[0].mxu0 %v3303_v28 }
 0x220   : > { %3711 = vmatpush1.msra.mxu0 %v3710_v57  ;;  %3774 = vmatprep.mubr.f32.mxu0 %v9369_v1 }
 0x221   : > { %3791 = vmatprep.subr.mxu0 %v3790_v5 }
 0x227   : > { %3780 = vmatmul.mubr.f32.vlgmr.msra.gmra.mrb[0].mxu0 %v3779_v3 }
 0x228   : > { %3797 = vmatpush1.msra.mxu0 %v3796_v56  ;;  %3860 = vmatprep.mubr.f32.mxu0 %v9369_v1 }
 0x229   : > { %3870 = vmatprep.subr.mxu0 %v3787_v54  ;;  %v4727_v54 = vsel %vm360_vm0, %v9115_v53, 0 }
 0x22f   : > { %3862 = vmatmul.mubr.f32.vlgmr.msra.gmra.mrb[0].mxu0 %v3775_v55 }
 0x230   : > { %3873 = vmatpush1.msra.mxu0 %v3793_v62  ;;  %3936 = vmatprep.mubr.f32.mxu0 %v9369_v1 }
 0x231   : > { %3946 = vmatprep.subr.mxu0 %v3708_v41 }
 0x237   : > { %3939 = vmatmul.mubr.f32.vlgmr.msra.gmra.mrb[0].mxu0 %v3776_v61 }
 0x238   : > { %3948 = vmatpush1.msra.mxu0 %v3710_v57  ;;  %4011 = vmatprep.mubr.f32.mxu0 %v9369_v1 }
 0x239   : > { %4024 = vmatprep.subr.mxu0 %v3788_v58 }
 0x23f   : > { %4015 = vmatmul.mubr.f32.vlgmr.msra.gmra.mrb[0].mxu0 %v3777_v4 }
 0x240   : > { %4028 = vmatpush1.msra.mxu0 %v3794_v2  ;;  %4091 = vmatprep.mubr.f32.mxu0 %v9369_v1 }
 0x241   : > { %4100 = vmatprep.subr.mxu0 %v3708_v41 }
 0x247   : > { %4093 = vmatmul.mubr.f32.vlgmr.msra.gmra.mrb[0].mxu0 %v3775_v55 }
 0x248   : > { %4102 = vmatpush1.msra.mxu0 %v3710_v57  ;;  %4165 = vmatprep.mubr.f32.mxu0 %v9369_v1 }
 0x249   : > { %4181 = vmatprep.subr.mxu0 %v4180_v8 }
 0x24f   : > { %4167 = vmatmul.mubr.f32.vlgmr.msra.gmra.mrb[0].mxu0 %v3775_v55  ;;  %v4796_v55 = vand.u32 4294901760, %v4727_v54 }
 0x250   : > { %4183 = vmatpush1.msra.mxu0 %v4182_v7  ;;  %4246 = vmatprep.mubr.f32.mxu0 %v9369_v1 }
 0x251   : > { %4263 = vmatprep.subr.mxu0 %v4262_v17  ;;  %v4797_v58 = vsub.f32 %v4727_v54, %v4796_v55  ;;  %v5195_v17 = vsel %vm360_vm0, %v4723_v44, 0 }
 0x252   : > { %v9823_v34 = vand.u32 4294901760, %v5195_v17 }
 0x253   : > { %v4798_v62 = vand.u32 4294901760, %v4797_v58 }
 0x254   : > { %v5265_v50 = vsub.f32 %v5195_v17, %v9823_v34 }
 0x255   : > { %v4799_v2 = vsub.f32 %v4797_v58, %v4798_v62 }
 0x257   : > { %4252 = vmatmul.mubr.f32.vlgmr.msra.gmra.mrb[0].mxu0 %v4251_v18  ;;  %v5266_v18 = vand.u32 4294901760, %v5265_v50 }
 0x258   : > { %4269 = vmatpush1.msra.mxu0 %v4268_v21  ;;  %4332 = vmatprep.mubr.f32.mxu0 %v9369_v1 }
 0x259   : > { %4342 = vmatprep.subr.mxu0 %v4259_v12  ;;  %v4800_v12 = vand.u32 4294901760, %v4799_v2 }
 0x25f   : > { %4334 = vmatmul.mubr.f32.vlgmr.msra.gmra.mrb[0].mxu0 %v4247_v6 }
 0x260   : > { %4345 = vmatpush1.msra.mxu0 %v4265_v51  ;;  %4408 = vmatprep.mubr.f32.mxu0 %v9369_v1 }
 0x261   : > { %4418 = vmatprep.subr.mxu0 %v4180_v8 }
 0x267   : > { %4411 = vmatmul.mubr.f32.vlgmr.msra.gmra.mrb[0].mxu0 %v4248_v14 }
 0x268   : > { %4420 = vmatpush1.msra.mxu0 %v4182_v7  ;;  %4483 = vmatprep.mubr.f32.mxu0 %v9369_v1 }
 0x269   : > { %4496 = vmatprep.subr.mxu0 %v4260_v0 }
 0x26f   : > { %4487 = vmatmul.mubr.f32.vlgmr.msra.gmra.mrb[0].mxu0 %v4249_v15 }
 0x270   : > { %4500 = vmatpush1.msra.mxu0 %v4266_v16  ;;  %4563 = vmatprep.mubr.f32.mxu0 %v9369_v1 }
 0x271   : > { %4572 = vmatprep.subr.mxu0 %v4180_v8 }
 0x277   : > { %4565 = vmatmul.mubr.f32.vlgmr.msra.gmra.mrb[0].mxu0 %v4247_v6 }
 0x278   : > { %4574 = vmatpush1.msra.mxu0 %v4182_v7  ;;  %4637 = vmatprep.mubr.f32.mxu0 %v9369_v1 }
 0x27f   : > { %4639 = vmatmul.mubr.f32.vlgmr.msra.gmra.mrb[0].mxu0 %v4247_v6 }
 0x352   : > { %v4640_v33 = vpop.f32.mrb[0].mxu0 }
 0x353   : > { %v4653_v22 = vadd.f32 %v4651_v49, %v4640_v33  ;;  %v4642_v23 = vpop.f32.mrb[1].mxu0  ;;  %v5267_v33 = vsub.f32 %v5265_v50, %v5266_v18 }
 0x354   : > { %v4654_v24 = vadd.f32 %v4651_v49, %v4642_v23 }
 0x355   : > { %v4659_v26 = vmul.f32 %v4653_v22, %v4653_v22 }
 0x356   : > { %v4655_v27 = vadd.f32 %v4654_v24, %v4653_v22  ;;  %v4660_v28 = vmul.f32 %v4654_v24, %v4654_v24 }
 0x358   : > { %4656 = vadd.xlane.f32.xlu1 %v4655_v27  ;;  %v4661_v39 = vadd.f32 %v4660_v28, %v4659_v26 }
 0x35a   : > { %4662 = vadd.xlane.f32.xlu0 %v4661_v39 }
 0x3e5   : > { %v4657_v48 = vpop.xlane.xlu1 %4656 }
 0x3e6   : > { %v4658_v30 = vmul.f32 0.00390625, %v4657_v48 }
 0x3e7   : > { %v4663_v31 = vpop.xlane.xlu0 %4662 }
 0x3e8   : > { %v4664_v32 = vmul.f32 0.00390625, %v4663_v31  ;;  %v4665_v25 = vmul.f32 %v4658_v30, %v4658_v30  ;;  %v4667_v36 = vsub.f32 %v4653_v22, %v4658_v30  ;;  %v4668_v42 = vsub.f32 %v4654_v24, %v4658_v30 }
 0x3ea   : > { %v4666_v29 = vsub.f32 %v4664_v32, %v4665_v25  ;;  %v5268_v32 = vand.u32 4294901760, %v5267_v33 }
 0x3ec   : > { %v4669_v35 = vadd.f32 1e-05, %v4666_v29 }
 0x3ee   : > { %9354 = vrsqrt.f32 %v4669_v35 }
 0x3f8   : > { %v9355_v43 = vpop.eup %9354 }
 0x3f9   : > { %v4671_v37 = vmul.f32 %v9355_v43, %v4667_v36  ;;  %v4672_v38 = vmul.f32 %v9355_v43, %v4668_v42 }
 0x3fb   : > { %v9758_v40 = vmax.f32 %v4671_v37, 0.0  ;;  %v9760_v41 = vmax.f32 %v4672_v38, 0.0 }
 0x3fd   : > { %4679 = vrot.lane.b32.xlu0 %v9760_v41, %s9371_s28  ;;  %4677 = vrot.lane.b32.xlu1 %v9758_v40, %s9371_s28 }
 0x401   : > { %4686 = vrot.lane.b32.xlu1 %v9760_v41, %s9370_s27 }
 0x405   : > { %4689 = vrot.lane.b32.xlu1 %v9758_v40, %s9370_s27  ;;  %s251_s27 = scalar_lea.vmem %s10012_s6, %s9125_s23 }
 0x46f   : > { %v4678_v57 = vpop.permute.xlu1 %4677  ;;  %v4680_v63 = vpop.permute.xlu0 %4679 }
 0x470   : > { %v4681_v5 = vsel %vm267_vm3, %v4678_v57, %v4680_v63  ;;  %v4685_v52 = vsel %vm267_vm3, %v4680_v63, %v4678_v57 }
 0x473   : > { %v4687_v61 = vpop.permute.xlu1 %4686 }
 0x477   : > { %v4690_v4 = vpop.permute.xlu1 %4689 }
 0x478   : > { %v4691_v46 = vsel %vm278_vm2, %v4690_v4, %v4687_v61  ;;  %v4694_v3 = vsel %vm278_vm2, %v4687_v61, %v4690_v4 }
 0x479   : > { %v4695_v56 = vsel %vm9468_vm5, %v4681_v5, %v4694_v3  ;;  %v4696_v47 = vsel %vm9464_vm4, %v4685_v52, %v4691_v46  ;;  %v9798_v15 = vsel %vm9501_vm8, %v4694_v3, %v4681_v5  ;;  %v9802_v16 = vsel %vm9497_vm7, %v4691_v46, %v4685_v52 }
 0x47a   : > { %4704 = vrot.lane.b32.xlu1 %v4695_v56, %s9372_s9  ;;  %v4731_v8 = vand.u32 4294901760, %v4695_v56  ;;  %4700 = vrot.lane.b32.xlu0 %v4696_v47, %s9372_s9  ;;  %v4729_v9 = vand.u32 4294901760, %v4696_v47 }
 0x47c   : > { %v4814_v6 = vsub.f32 %v4695_v56, %v4731_v8  ;;  %v4808_v7 = vsub.f32 %v4696_v47, %v4729_v9  ;;  %4730 = vmatprep.subr.mxu1 %v4729_v9 }
 0x47d   : > { %4732 = vmatpush1.msra.mxu1 %v4731_v8 }
 0x47e   : > { %4712 = vrot.lane.b32.xlu1 %v4696_v47, %s9373_s10  ;;  %4710 = vrot.lane.b32.xlu0 %v4695_v56, %s9373_s10  ;;  %v4809_v20 = vand.u32 4294901760, %v4808_v7  ;;  %v4815_v0 = vand.u32 4294901760, %v4814_v6 }
 0x47f   : > { %4801 = vmatmul.mubr.f32.vlgmr.msra.gmra.mrb[0].mxu1 %v4800_v12 }
 0x480   : > { %v4810_v19 = vsub.f32 %v4808_v7, %v4809_v20  ;;  %v4816_v14 = vsub.f32 %v4814_v6, %v4815_v0  ;;  %4881 = vmatprep.mubr.f32.mxu1 %v9369_v1 }
 0x482   : > { %6137 = vrot.lane.b32.xlu1 %v9758_v40, %s9372_s9  ;;  %6134 = vrot.lane.b32.xlu0 %v9760_v41, %s9372_s9  ;;  %v4811_v51 = vand.u32 4294901760, %v4810_v19  ;;  %v4817_v13 = vand.u32 4294901760, %v4816_v14 }
 0x484   : > { %4812 = vmatprep.subr.mxu1 %v4811_v51 }
 0x485   : > { %4818 = vmatpush1.msra.mxu1 %v4817_v13 }
 0x486   : > { %6145 = vrot.lane.b32.xlu1 %v9760_v41, %s9373_s10  ;;  %6143 = vrot.lane.b32.xlu0 %v9758_v40, %s9373_s10 }
 0x487   : > { %4883 = vmatmul.mubr.f32.vlgmr.msra.gmra.mrb[0].mxu1 %v4796_v55  ;;  %4891 = vmatprep.subr.mxu1 %v4808_v7 }
 0x488   : > { %4894 = vmatpush1.msra.mxu1 %v4814_v6  ;;  %4957 = vmatprep.mubr.f32.mxu1 %v9369_v1 }
 0x489   : > { %4967 = vmatprep.subr.mxu1 %v4729_v9 }
 0x48a   : > { %7577 = vrot.lane.b32.xlu1 %v9798_v15, %s9372_s9  ;;  %7573 = vrot.lane.b32.xlu0 %v9802_v16, %s9372_s9 }
 0x48e   : > { %7585 = vrot.lane.b32.xlu1 %v9802_v16, %s9373_s10  ;;  %7583 = vrot.lane.b32.xlu0 %v9798_v15, %s9373_s10 }
 0x48f   : > { %4960 = vmatmul.mubr.f32.vlgmr.msra.gmra.mrb[0].mxu1 %v4797_v58 }
 0x490   : > { %4969 = vmatpush1.msra.mxu1 %v4731_v8  ;;  %5032 = vmatprep.mubr.f32.mxu1 %v9369_v1 }
 0x491   : > { %5045 = vmatprep.subr.mxu1 %v4809_v20  ;;  %v9116_v20 = vld [vmem:[%s10010_s4 + $0x10] sm:$0xff] }
 0x492   : > { %9015 = vperm.xlu0 %9353, %v9012_v45   ;;  %v5665_v19 = vsel %vm360_vm0, %v9116_v20, 0 }
 0x493   : > { %v5734_v13 = vand.u32 4294901760, %v5665_v19 }
 0x495   : > { %v5735_v44 = vsub.f32 %v5665_v19, %v5734_v13 }
 0x497   : > { %5036 = vmatmul.mubr.f32.vlgmr.msra.gmra.mrb[0].mxu1 %v4798_v62 }
 0x498   : > { %5049 = vmatpush1.msra.mxu1 %v4815_v0  ;;  %5112 = vmatprep.mubr.f32.mxu1 %v9369_v1 }
 0x499   : > { %5121 = vmatprep.subr.mxu1 %v4729_v9 }
 0x49f   : > { %5114 = vmatmul.mubr.f32.vlgmr.msra.gmra.mrb[0].mxu1 %v4796_v55 }
 0x4a0   : > { %5123 = vmatpush1.msra.mxu1 %v4731_v8  ;;  %5186 = vmatprep.mubr.f32.mxu1 %v9369_v1 }
 0x4a7   : > { %5188 = vmatmul.mubr.f32.vlgmr.msra.gmra.mrb[0].mxu1 %v4796_v55 }
 0x4a8   : > { %5263 = vmatprep.mubr.f32.mxu1 %v9369_v1 }
 0x4ec   : > { %v4705_v21 = vpop.permute.xlu1 %4704  ;;  %v4701_v49 = vpop.permute.xlu0 %4700 }
 0x4ed   : > { %v4706_v24 = vsel %vm316_vm11, %v4705_v21, %v4701_v49  ;;  %v4709_v26 = vsel %vm316_vm11, %v4701_v49, %v4705_v21 }
 0x4f0   : > { %v4713_v22 = vpop.permute.xlu1 %4712  ;;  %v4711_v23 = vpop.permute.xlu0 %4710 }
 0x4f1   : > { %v4714_v27 = vsel %vm325_vm12, %v4711_v23, %v4713_v22  ;;  %v4718_v28 = vsel %vm325_vm12, %v4713_v22, %v4711_v23 }
 0x4f2   : > { %v4719_v39 = vsel %vm9546_vm13, %v4714_v27, %v4709_v26  ;;  %v4720_v48 = vsel %vm9550_vm14, %v4718_v28, %v4706_v24  ;;  %v4722_v7 = vsel %vm9588_vm1, %v4706_v24, %v4718_v28  ;;  %v4721_v14 = vsel %vm9584_vm15, %v4709_v26, %v4714_v27  ;;  %v9117_v24 = vld [vmem:[%s10010_s4 + $0x18] sm:$0xff] }
 0x4f3   : > { %v5197_v30 = vand.u32 4294901760, %v4720_v48  ;;  %v5199_v31 = vand.u32 4294901760, %v4719_v39  ;;  %v5667_v0 = vand.u32 4294901760, %v4722_v7  ;;  %v5669_v45 = vand.u32 4294901760, %v4721_v14 }
 0x4f4   : > { %v6138_v25 = vpop.permute.xlu1 %6137  ;;  %v6135_v29 = vpop.permute.xlu0 %6134  ;;  %v6159_v27 = vsel %vm360_vm0, %v9117_v24, 0  ;;  %v9120_v24 = vld [vmem:[%s10010_s4 + $0x30] sm:$0xff] }
 0x4f5   : > { %v5276_v35 = vsub.f32 %v4720_v48, %v5197_v30  ;;  %v5282_v36 = vsub.f32 %v4719_v39, %v5199_v31  ;;  %5198 = vmatprep.subr.mxu1 %v5197_v30  ;;  %v9835_v37 = vsel %vm316_vm11, %v6138_v25, %v6135_v29  ;;  %v9838_v38 = vsel %vm316_vm11, %v6135_v29, %v6138_v25 }
 0x4f6   : > { %5200 = vmatpush1.msra.mxu1 %v5199_v31  ;;  %v5746_v51 = vsub.f32 %v4722_v7, %v5667_v0  ;;  %v5752_v17 = vsub.f32 %v4721_v14, %v5669_v45  ;;  %v6228_v48 = vand.u32 4294901760, %v6159_v27 }
 0x4f7   : > { %v5283_v42 = vand.u32 4294901760, %v5282_v36  ;;  %5269 = vmatmul.mubr.f32.vlgmr.msra.gmra.mrb[0].mxu1 %v5268_v32  ;;  %v5277_v43 = vand.u32 4294901760, %v5276_v35 }
 0x4f8   : > { %v6146_v53 = vpop.permute.xlu1 %6145  ;;  %v6144_v54 = vpop.permute.xlu0 %6143  ;;  %5349 = vmatprep.mubr.f32.mxu1 %v9369_v1  ;;  %v5747_v10 = vand.u32 4294901760, %v5746_v51  ;;  %v5753_v21 = vand.u32 4294901760, %v5752_v17  ;;  %v6229_v32 = vsub.f32 %v6159_v27, %v6228_v48  ;;  %v7599_v27 = vsel %vm360_vm0, %v9120_v24, 0 }
 0x4f9   : > { %v9842_v55 = vsel %vm325_vm12, %v6144_v54, %v6146_v53  ;;  %v9845_v57 = vsel %vm325_vm12, %v6146_v53, %v6144_v54  ;;  %v5278_v58 = vsub.f32 %v5276_v35, %v5277_v43  ;;  %v5284_v61 = vsub.f32 %v5282_v36, %v5283_v42  ;;  %v9118_v54 = vld [vmem:[%s10010_s4 + $0x20] sm:$0xff] }
 0x4fa   : > { %v9851_v62 = vsel %vm9584_vm15, %v9838_v38, %v9842_v55  ;;  %v9857_v63 = vsel %vm9588_vm1, %v9835_v37, %v9845_v57  ;;  %v5754_v33 = vsub.f32 %v5752_v17, %v5753_v21  ;;  %v6152_v28 = vsel %vm9546_vm13, %v9842_v55, %v9838_v38 }
 0x4fb   : > { %v5279_v5 = vand.u32 4294901760, %v5278_v58  ;;  %v5285_v52 = vand.u32 4294901760, %v5284_v61  ;;  %v6633_v55 = vand.u32 4294901760, %v9760_v41  ;;  %v7668_v60 = vand.u32 4294901760, %v7599_v27 }
 0x4fc   : > { %v7578_v4 = vpop.permute.xlu1 %7577  ;;  %v7574_v2 = vpop.permute.xlu0 %7573  ;;  %v5755_v23 = vand.u32 4294901760, %v5754_v33 }
 0x4fd   : > { %5280 = vmatprep.subr.mxu1 %v5279_v5  ;;  %v9860_v46 = vsel %vm316_vm11, %v7578_v4, %v7574_v2  ;;  %v9864_v47 = vsel %vm316_vm11, %v7574_v2, %v7578_v4  ;;  %v6712_v58 = vsub.f32 %v9760_v41, %v6633_v55  ;;  %v6635_v4 = vand.u32 4294901760, %v9758_v40 }
 0x4fe   : > { %5286 = vmatpush1.msra.mxu1 %v5285_v52 }
 0x4ff   : > { %5351 = vmatmul.mubr.f32.vlgmr.msra.gmra.mrb[0].mxu1 %v9823_v34  ;;  %5359 = vmatprep.subr.mxu1 %v5276_v35  ;;  %v6230_v35 = vand.u32 4294901760, %v6229_v32  ;;  %v6713_v2 = vand.u32 4294901760, %v6712_v58  ;;  %v6718_v52 = vsub.f32 %v9758_v40, %v6635_v4  ;;  %v9119_v40 = vld [vmem:[%s10010_s4 + $0x28] sm:$0xff] }
 0x500   : > { %v7586_v3 = vpop.permute.xlu1 %7585  ;;  %v7584_v56 = vpop.permute.xlu0 %7583  ;;  %5362 = vmatpush1.msra.mxu1 %v5282_v36  ;;  %5425 = vmatprep.mubr.f32.mxu1 %v9369_v1 }
 0x501   : > { %v9867_v8 = vsel %vm325_vm12, %v7584_v56, %v7586_v3  ;;  %v9870_v9 = vsel %vm325_vm12, %v7586_v3, %v7584_v56  ;;  %5435 = vmatprep.subr.mxu1 %v5197_v30  ;;  %v6714_v3 = vsub.f32 %v6712_v58, %v6713_v2  ;;  %v6719_v7 = vand.u32 4294901760, %v6718_v52 }
 0x502   : > { %v9877_v12 = vsel %vm9584_vm15, %v9864_v47, %v9867_v8  ;;  %v9883_v6 = vsel %vm9588_vm1, %v9860_v46, %v9870_v9 }
 0x503   : > { %v6715_v20 = vand.u32 4294901760, %v6714_v3  ;;  %v6720_v41 = vsub.f32 %v6718_v52, %v6719_v7 }
 0x505   : > { %v6721_v14 = vand.u32 4294901760, %v6720_v41  ;;  %v8547_v41 = vand.u32 4294901760, %v9877_v12 }
 0x507   : > { %5428 = vmatmul.mubr.f32.vlgmr.msra.gmra.mrb[0].mxu1 %v5265_v50  ;;  %v5748_v50 = vsub.f32 %v5746_v51, %v5747_v10 }
 0x508   : > { %5437 = vmatpush1.msra.mxu1 %v5199_v31  ;;  %5500 = vmatprep.mubr.f32.mxu1 %v9369_v1 }
 0x509   : > { %5513 = vmatprep.subr.mxu1 %v5277_v43  ;;  %v5749_v49 = vand.u32 4294901760, %v5748_v50  ;;  %v6231_v43 = vsub.f32 %v6229_v32, %v6230_v35 }
 0x50b   : > { %v6232_v38 = vand.u32 4294901760, %v6231_v43 }
 0x50f   : > { %5504 = vmatmul.mubr.f32.vlgmr.msra.gmra.mrb[0].mxu1 %v5266_v18  ;;  %v5736_v18 = vand.u32 4294901760, %v5735_v44 }
 0x510   : > { %5517 = vmatpush1.msra.mxu1 %v5283_v42  ;;  %5580 = vmatprep.mubr.f32.mxu1 %v9369_v1 }
 0x511   : > { %5589 = vmatprep.subr.mxu1 %v5197_v30  ;;  %v5737_v11 = vsub.f32 %v5735_v44, %v5736_v18  ;;  %v6163_v30 = vand.u32 4294901760, %v6152_v28 }
 0x513   : > { %v5738_v22 = vand.u32 4294901760, %v5737_v11  ;;  %v6246_v25 = vsub.f32 %v6152_v28, %v6163_v30  ;;  %v7592_v28 = vsel %vm9546_vm13, %v9867_v8, %v9864_v47 }
 0x515   : > { %v6247_v36 = vand.u32 4294901760, %v6246_v25 }
 0x517   : > { %5582 = vmatmul.mubr.f32.vlgmr.msra.gmra.mrb[0].mxu1 %v9823_v34 }
 0x518   : > { %5591 = vmatpush1.msra.mxu1 %v5199_v31  ;;  %5654 = vmatprep.mubr.f32.mxu1 %v9369_v1 }
 0x519   : > { %5668 = vmatprep.subr.mxu1 %v5667_v0 }
 0x51f   : > { %5656 = vmatmul.mubr.f32.vlgmr.msra.gmra.mrb[0].mxu1 %v9823_v34  ;;  %v6153_v34 = vsel %vm9550_vm14, %v9845_v57, %v9835_v37  ;;  %v6248_v37 = vsub.f32 %v6246_v25, %v6247_v36  ;;  %v6631_v57 = vsel %vm360_vm0, %v9118_v54, 0 }
 0x520   : > { %5670 = vmatpush1.msra.mxu1 %v5669_v45  ;;  %5733 = vmatprep.mubr.f32.mxu1 %v9369_v1  ;;  %v6161_v26 = vand.u32 4294901760, %v6153_v34  ;;  %v6700_v61 = vand.u32 4294901760, %v6631_v57 }
 0x521   : > { %5750 = vmatprep.subr.mxu1 %v5749_v49  ;;  %v6249_v53 = vand.u32 4294901760, %v6248_v37 }
 0x522   : > { %v6240_v39 = vsub.f32 %v6153_v34, %v6161_v26  ;;  %v6701_v5 = vsub.f32 %v6631_v57, %v6700_v61 }
 0x524   : > { %v6241_v31 = vand.u32 4294901760, %v6240_v39  ;;  %v6702_v56 = vand.u32 4294901760, %v6701_v5 }
 0x526   : > { %v6242_v29 = vsub.f32 %v6240_v39, %v6241_v31 }
 0x527   : > { %5739 = vmatmul.mubr.f32.vlgmr.msra.gmra.mrb[0].mxu1 %v5738_v22 }
 0x528   : > { %5756 = vmatpush1.msra.mxu1 %v5755_v23  ;;  %5819 = vmatprep.mubr.f32.mxu1 %v9369_v1  ;;  %v6243_v42 = vand.u32 4294901760, %v6242_v29 }
 0x529   : > { %5829 = vmatprep.subr.mxu1 %v5746_v51  ;;  %v7105_v51 = vand.u32 4294901760, %v9857_v63 }
 0x52f   : > { %5821 = vmatmul.mubr.f32.vlgmr.msra.gmra.mrb[0].mxu1 %v5734_v13 }
 0x530   : > { %5832 = vmatpush1.msra.mxu1 %v5752_v17  ;;  %5895 = vmatprep.mubr.f32.mxu1 %v9369_v1 }
 0x531   : > { %5905 = vmatprep.subr.mxu1 %v5667_v0 }
 0x537   : > { %5898 = vmatmul.mubr.f32.vlgmr.msra.gmra.mrb[0].mxu1 %v5735_v44  ;;  %v7107_v44 = vand.u32 4294901760, %v9851_v62 }
 0x538   : > { %5907 = vmatpush1.msra.mxu1 %v5669_v45  ;;  %5970 = vmatprep.mubr.f32.mxu1 %v9369_v1 }
 0x539   : > { %5983 = vmatprep.subr.mxu1 %v5747_v10 }
 0x53f   : > { %5974 = vmatmul.mubr.f32.vlgmr.msra.gmra.mrb[0].mxu1 %v5736_v18  ;;  %v7190_v18 = vsub.f32 %v9851_v62, %v7107_v44  ;;  %v7593_v62 = vsel %vm9550_vm14, %v9870_v9, %v9860_v46  ;;  %v7603_v46 = vand.u32 4294901760, %v7592_v28 }
 0x540   : > { %5987 = vmatpush1.msra.mxu1 %v5753_v21  ;;  %6050 = vmatprep.mubr.f32.mxu1 %v9369_v1 }
 0x541   : > { %6059 = vmatprep.subr.mxu1 %v5667_v0  ;;  %v6703_v0 = vsub.f32 %v6701_v5, %v6702_v56  ;;  %v7191_v11 = vand.u32 4294901760, %v7190_v18 }
 0x543   : > { %v6704_v19 = vand.u32 4294901760, %v6703_v0 }
 0x547   : > { %6052 = vmatmul.mubr.f32.vlgmr.msra.gmra.mrb[0].mxu1 %v5734_v13 }
 0x548   : > { %6061 = vmatpush1.msra.mxu1 %v5669_v45  ;;  %6124 = vmatprep.mubr.f32.mxu1 %v9369_v1  ;;  %v7184_v45 = vsub.f32 %v9857_v63, %v7105_v51  ;;  %v7192_v63 = vsub.f32 %v7190_v18, %v7191_v11 }
 0x549   : > { %6162 = vmatprep.subr.mxu1 %v6161_v26 }
 0x54a   : > { %v7185_v17 = vand.u32 4294901760, %v7184_v45  ;;  %v7193_v34 = vand.u32 4294901760, %v7192_v63 }
 0x54c   : > { %v7186_v21 = vsub.f32 %v7184_v45, %v7185_v17 }
 0x54e   : > { %v7187_v33 = vand.u32 4294901760, %v7186_v21 }
 0x54f   : > { %6126 = vmatmul.mubr.f32.vlgmr.msra.gmra.mrb[0].mxu1 %v5734_v13  ;;  %v7103_v13 = vsel %vm360_vm0, %v9119_v40, 0  ;;  %v8630_v40 = vsub.f32 %v9877_v12, %v8547_v41  ;;  %v9016_v12 = vpop.permute.xlu0 %9015 }
 0x550   : > { %6164 = vmatpush1.msra.mxu1 %v6163_v30  ;;  %6227 = vmatprep.mubr.f32.mxu1 %v9369_v1  ;;  %v7172_v10 = vand.u32 4294901760, %v7103_v13 }
 0x551   : > { %6244 = vmatprep.subr.mxu1 %v6243_v42  ;;  %v8073_v42 = vand.u32 4294901760, %v9802_v16 }
 0x552   : > { %v7173_v50 = vsub.f32 %v7103_v13, %v7172_v10 }
 0x553   : > { %v8152_v37 = vsub.f32 %v9802_v16, %v8073_v42 }
 0x554   : > { %v7174_v49 = vand.u32 4294901760, %v7173_v50 }
 0x555   : > { %v8153_v54 = vand.u32 4294901760, %v8152_v37 }
 0x556   : > { %v7175_v22 = vsub.f32 %v7173_v50, %v7174_v49 }
 0x557   : > { %6233 = vmatmul.mubr.f32.vlgmr.msra.gmra.mrb[0].mxu1 %v6232_v38 }
 0x558   : > { %6250 = vmatpush1.msra.mxu1 %v6249_v53  ;;  %6313 = vmatprep.mubr.f32.mxu1 %v9369_v1  ;;  %v7176_v23 = vand.u32 4294901760, %v7175_v22  ;;  %v8075_v53 = vand.u32 4294901760, %v9798_v15 }
 0x559   : > { %6323 = vmatprep.subr.mxu1 %v6240_v39 }
 0x55a   : > { %v8158_v57 = vsub.f32 %v9798_v15, %v8075_v53  ;;  %v9122_v15 = vld [vmem:[%s10010_s4 + $0x40] sm:$0xff] }
 0x55f   : > { %6315 = vmatmul.mubr.f32.vlgmr.msra.gmra.mrb[0].mxu1 %v6228_v48 }
 0x560   : > { %6326 = vmatpush1.msra.mxu1 %v6246_v25  ;;  %6389 = vmatprep.mubr.f32.mxu1 %v9369_v1 }
 0x561   : > { %6399 = vmatprep.subr.mxu1 %v6161_v26 }
 0x567   : > { %6392 = vmatmul.mubr.f32.vlgmr.msra.gmra.mrb[0].mxu1 %v6229_v32 }
 0x568   : > { %6401 = vmatpush1.msra.mxu1 %v6163_v30  ;;  %6464 = vmatprep.mubr.f32.mxu1 %v9369_v1 }
 0x569   : > { %6477 = vmatprep.subr.mxu1 %v6241_v31 }
 0x56f   : > { %6468 = vmatmul.mubr.f32.vlgmr.msra.gmra.mrb[0].mxu1 %v6230_v35 }
 0x570   : > { %6481 = vmatpush1.msra.mxu1 %v6247_v36  ;;  %6544 = vmatprep.mubr.f32.mxu1 %v9369_v1  ;;  %v9121_v36 = vld [vmem:[%s10010_s4 + $0x38] sm:$0xff] }
 0x571   : > { %6553 = vmatprep.subr.mxu1 %v6161_v26  ;;  %v7601_v26 = vand.u32 4294901760, %v7593_v62  ;;  %v8071_v43 = vsel %vm360_vm0, %v9121_v36, 0 }
 0x572   : > { %v8140_v38 = vand.u32 4294901760, %v8071_v43 }
 0x573   : > { %v7680_v39 = vsub.f32 %v7593_v62, %v7601_v26 }
 0x575   : > { %v7681_v9 = vand.u32 4294901760, %v7680_v39 }
 0x577   : > { %6546 = vmatmul.mubr.f32.vlgmr.msra.gmra.mrb[0].mxu1 %v6228_v48  ;;  %v7682_v31 = vsub.f32 %v7680_v39, %v7681_v9 }
 0x578   : > { %6555 = vmatpush1.msra.mxu1 %v6163_v30  ;;  %6618 = vmatprep.mubr.f32.mxu1 %v9369_v1  ;;  %v7686_v30 = vsub.f32 %v7592_v28, %v7603_v46 }
 0x579   : > { %6634 = vmatprep.subr.mxu1 %v6633_v55  ;;  %v7683_v29 = vand.u32 4294901760, %v7682_v31 }
 0x57a   : > { %v7687_v25 = vand.u32 4294901760, %v7686_v30 }
 0x57c   : > { %v7688_v59 = vsub.f32 %v7686_v30, %v7687_v25 }
 0x57e   : > { %v7689_v8 = vand.u32 4294901760, %v7688_v59 }
 0x57f   : > { %6620 = vmatmul.mubr.f32.vlgmr.msra.gmra.mrb[0].mxu1 %v6228_v48  ;;  %v7669_v48 = vsub.f32 %v7599_v27, %v7668_v60 }
 0x580   : > { %6636 = vmatpush1.msra.mxu1 %v6635_v4  ;;  %6699 = vmatprep.mubr.f32.mxu1 %v9369_v1 }
 0x581   : > { %6716 = vmatprep.subr.mxu1 %v6715_v20  ;;  %v7670_v32 = vand.u32 4294901760, %v7669_v48 }
 0x583   : > { %v7671_v35 = vsub.f32 %v7669_v48, %v7670_v32 }
 0x585   : > { %v7672_v47 = vand.u32 4294901760, %v7671_v35 }
 0x587   : > { %6705 = vmatmul.mubr.f32.vlgmr.msra.gmra.mrb[0].mxu1 %v6704_v19 }
 0x588   : > { %6722 = vmatpush1.msra.mxu1 %v6721_v14  ;;  %6785 = vmatprep.mubr.f32.mxu1 %v9369_v1 }
 0x589   : > { %6795 = vmatprep.subr.mxu1 %v6712_v58  ;;  %v8154_v58 = vsub.f32 %v8152_v37, %v8153_v54 }
 0x58f   : > { %6787 = vmatmul.mubr.f32.vlgmr.msra.gmra.mrb[0].mxu1 %v6700_v61 }
 0x590   : > { %6798 = vmatpush1.msra.mxu1 %v6718_v52  ;;  %6861 = vmatprep.mubr.f32.mxu1 %v9369_v1 }
 0x591   : > { %6871 = vmatprep.subr.mxu1 %v6633_v55 }
 0x597   : > { %6864 = vmatmul.mubr.f32.vlgmr.msra.gmra.mrb[0].mxu1 %v6701_v5 }
 0x598   : > { %6873 = vmatpush1.msra.mxu1 %v6635_v4  ;;  %6936 = vmatprep.mubr.f32.mxu1 %v9369_v1 }
 0x599   : > { %6949 = vmatprep.subr.mxu1 %v6713_v2  ;;  %v8155_v2 = vand.u32 4294901760, %v8154_v58 }
 0x59f   : > { %6940 = vmatmul.mubr.f32.vlgmr.msra.gmra.mrb[0].mxu1 %v6702_v56  ;;  %v8545_v56 = vand.u32 4294901760, %v9883_v6 }
 0x5a0   : > { %6953 = vmatpush1.msra.mxu1 %v6719_v7  ;;  %7016 = vmatprep.mubr.f32.mxu1 %v9369_v1  ;;  %v8543_v7 = vsel %vm360_vm0, %v9122_v15, 0 }
 0x5a1   : > { %7025 = vmatprep.subr.mxu1 %v6633_v55  ;;  %v8141_v55 = vsub.f32 %v8071_v43, %v8140_v38  ;;  %v8624_v20 = vsub.f32 %v9883_v6, %v8545_v56  ;;  %v8612_v0 = vand.u32 4294901760, %v8543_v7 }
 0x5a3   : > { %v8625_v19 = vand.u32 4294901760, %v8624_v20  ;;  %v8613_v14 = vsub.f32 %v8543_v7, %v8612_v0 }
 0x5a5   : > { %v8614_v13 = vand.u32 4294901760, %v8613_v14 }
 0x5a7   : > { %7018 = vmatmul.mubr.f32.vlgmr.msra.gmra.mrb[0].mxu1 %v6700_v61 }
 0x5a8   : > { %7027 = vmatpush1.msra.mxu1 %v6635_v4  ;;  %7090 = vmatprep.mubr.f32.mxu1 %v9369_v1  ;;  %v8159_v4 = vand.u32 4294901760, %v8158_v57 }
 0x5a9   : > { %7106 = vmatprep.subr.mxu1 %v7105_v51 }
 0x5aa   : > { %v8160_v16 = vsub.f32 %v8158_v57, %v8159_v4 }
 0x5ac   : > { %v8161_v3 = vand.u32 4294901760, %v8160_v16 }
 0x5af   : > { %7092 = vmatmul.mubr.f32.vlgmr.msra.gmra.mrb[0].mxu1 %v6700_v61  ;;  %v8142_v61 = vand.u32 4294901760, %v8141_v55 }
 0x5b0   : > { %7108 = vmatpush1.msra.mxu1 %v7107_v44  ;;  %7171 = vmatprep.mubr.f32.mxu1 %v9369_v1 }
 0x5b1   : > { %7188 = vmatprep.subr.mxu1 %v7187_v33  ;;  %v8143_v5 = vsub.f32 %v8141_v55, %v8142_v61 }
 0x5b3   : > { %v8144_v52 = vand.u32 4294901760, %v8143_v5 }
 0x5b7   : > { %7177 = vmatmul.mubr.f32.vlgmr.msra.gmra.mrb[0].mxu1 %v7176_v23 }
 0x5b8   : > { %7194 = vmatpush1.msra.mxu1 %v7193_v34  ;;  %7257 = vmatprep.mubr.f32.mxu1 %v9369_v1 }
 0x5b9   : > { %7267 = vmatprep.subr.mxu1 %v7184_v45  ;;  %v8631_v45 = vand.u32 4294901760, %v8630_v40 }
 0x5bb   : > { %v8632_v6 = vsub.f32 %v8630_v40, %v8631_v45 }
 0x5bf   : > { %7259 = vmatmul.mubr.f32.vlgmr.msra.gmra.mrb[0].mxu1 %v7172_v10 }
 0x5c0   : > { %7270 = vmatpush1.msra.mxu1 %v7190_v18  ;;  %7333 = vmatprep.mubr.f32.mxu1 %v9369_v1 }
 0x5c1   : > { %7343 = vmatprep.subr.mxu1 %v7105_v51 }
 0x5c7   : > { %7336 = vmatmul.mubr.f32.vlgmr.msra.gmra.mrb[0].mxu1 %v7173_v50  ;;  %v8633_v50 = vand.u32 4294901760, %v8632_v6 }
 0x5c8   : > { %7345 = vmatpush1.msra.mxu1 %v7107_v44  ;;  %7408 = vmatprep.mubr.f32.mxu1 %v9369_v1 }
 0x5c9   : > { %7421 = vmatprep.subr.mxu1 %v7185_v17 }
 0x5cf   : > { %7412 = vmatmul.mubr.f32.vlgmr.msra.gmra.mrb[0].mxu1 %v7174_v49 }
 0x5d0   : > { %7425 = vmatpush1.msra.mxu1 %v7191_v11  ;;  %7488 = vmatprep.mubr.f32.mxu1 %v9369_v1 }
 0x5d1   : > { %7497 = vmatprep.subr.mxu1 %v7105_v51  ;;  %v8626_v51 = vsub.f32 %v8624_v20, %v8625_v19 }
 0x5d7   : > { %7490 = vmatmul.mubr.f32.vlgmr.msra.gmra.mrb[0].mxu1 %v7172_v10 }
 0x5d8   : > { %7499 = vmatpush1.msra.mxu1 %v7107_v44  ;;  %7562 = vmatprep.mubr.f32.mxu1 %v9369_v1  ;;  %v8615_v44 = vsub.f32 %v8613_v14, %v8614_v13 }
 0x5d9   : > { %7602 = vmatprep.subr.mxu1 %v7601_v26 }
 0x5da   : > { %v8616_v17 = vand.u32 4294901760, %v8615_v44 }
 0x5df   : > { %7564 = vmatmul.mubr.f32.vlgmr.msra.gmra.mrb[0].mxu1 %v7172_v10  ;;  %v8627_v10 = vand.u32 4294901760, %v8626_v51 }
 0x5e0   : > { %7604 = vmatpush1.msra.mxu1 %v7603_v46  ;;  %7667 = vmatprep.mubr.f32.mxu1 %v9369_v1 }
 0x5e1   : > { %7684 = vmatprep.subr.mxu1 %v7683_v29 }
 0x5e7   : > { %7673 = vmatmul.mubr.f32.vlgmr.msra.gmra.mrb[0].mxu1 %v7672_v47 }
 0x5e8   : > { %7690 = vmatpush1.msra.mxu1 %v7689_v8  ;;  %7753 = vmatprep.mubr.f32.mxu1 %v9369_v1 }
 0x5e9   : > { %7763 = vmatprep.subr.mxu1 %v7680_v39 }
 0x5ef   : > { %7755 = vmatmul.mubr.f32.vlgmr.msra.gmra.mrb[0].mxu1 %v7668_v60 }
 0x5f0   : > { %7766 = vmatpush1.msra.mxu1 %v7686_v30  ;;  %7829 = vmatprep.mubr.f32.mxu1 %v9369_v1  ;;  %v9358_v30 = vld [vmem:[%s9428_s26] sm:$0xff] }
 0x5f1   : > { %7839 = vmatprep.subr.mxu1 %v7601_v26 }
 0x5f7   : > { %7832 = vmatmul.mubr.f32.vlgmr.msra.gmra.mrb[0].mxu1 %v7669_v48 }
 0x5f8   : > { %7841 = vmatpush1.msra.mxu1 %v7603_v46  ;;  %7904 = vmatprep.mubr.f32.mxu1 %v9369_v1 }
 0x5f9   : > { %7917 = vmatprep.subr.mxu1 %v7681_v9 }
 0x5ff   : > { %7908 = vmatmul.mubr.f32.vlgmr.msra.gmra.mrb[0].mxu1 %v7670_v32  ;;  %v9359_v32 = vld [vmem:[%s9428_s26 + $0x8] sm:$0xff] }
 0x600   : > { %7921 = vmatpush1.msra.mxu1 %v7687_v25  ;;  %7984 = vmatprep.mubr.f32.mxu1 %v9369_v1 }
 0x601   : > { %7993 = vmatprep.subr.mxu1 %v7601_v26 }
 0x607   : > { %7986 = vmatmul.mubr.f32.vlgmr.msra.gmra.mrb[0].mxu1 %v7668_v60 }
 0x608   : > { %7995 = vmatpush1.msra.mxu1 %v7603_v46  ;;  %8058 = vmatprep.mubr.f32.mxu1 %v9369_v1 }
 0x609   : > { %8074 = vmatprep.subr.mxu1 %v8073_v42 }
 0x60f   : > { %8060 = vmatmul.mubr.f32.vlgmr.msra.gmra.mrb[0].mxu1 %v7668_v60 }
 0x610   : > { %8076 = vmatpush1.msra.mxu1 %v8075_v53  ;;  %8139 = vmatprep.mubr.f32.mxu1 %v9369_v1 }
 0x611   : > { %8156 = vmatprep.subr.mxu1 %v8155_v2 }
 0x617   : > { %8145 = vmatmul.mubr.f32.vlgmr.msra.gmra.mrb[0].mxu1 %v8144_v52 }
 0x618   : > { %8162 = vmatpush1.msra.mxu1 %v8161_v3  ;;  %8225 = vmatprep.mubr.f32.mxu1 %v9369_v1 }
 0x619   : > { %8235 = vmatprep.subr.mxu1 %v8152_v37 }
 0x61f   : > { %8227 = vmatmul.mubr.f32.vlgmr.msra.gmra.mrb[0].mxu1 %v8140_v38 }
 0x620   : > { %8238 = vmatpush1.msra.mxu1 %v8158_v57  ;;  %8301 = vmatprep.mubr.f32.mxu1 %v9369_v1 }
 0x621   : > { %8311 = vmatprep.subr.mxu1 %v8073_v42 }
 0x627   : > { %8304 = vmatmul.mubr.f32.vlgmr.msra.gmra.mrb[0].mxu1 %v8141_v55 }
 0x628   : > { %8313 = vmatpush1.msra.mxu1 %v8075_v53  ;;  %8376 = vmatprep.mubr.f32.mxu1 %v9369_v1 }
 0x629   : > { %8389 = vmatprep.subr.mxu1 %v8153_v54 }
 0x62f   : > { %8380 = vmatmul.mubr.f32.vlgmr.msra.gmra.mrb[0].mxu1 %v8142_v61 }
 0x630   : > { %8393 = vmatpush1.msra.mxu1 %v8159_v4  ;;  %8456 = vmatprep.mubr.f32.mxu1 %v9369_v1 }
 0x631   : > { %8465 = vmatprep.subr.mxu1 %v8073_v42 }
 0x637   : > { %8458 = vmatmul.mubr.f32.vlgmr.msra.gmra.mrb[0].mxu1 %v8140_v38 }
 0x638   : > { %8467 = vmatpush1.msra.mxu1 %v8075_v53  ;;  %8530 = vmatprep.mubr.f32.mxu1 %v9369_v1 }
 0x639   : > { %8546 = vmatprep.subr.mxu1 %v8545_v56 }
 0x63f   : > { %8532 = vmatmul.mubr.f32.vlgmr.msra.gmra.mrb[0].mxu1 %v8140_v38 }
 0x640   : > { %8548 = vmatpush1.msra.mxu1 %v8547_v41  ;;  %8611 = vmatprep.mubr.f32.mxu1 %v9369_v1 }
 0x641   : > { %8628 = vmatprep.subr.mxu1 %v8627_v10 }
 0x647   : > { %8617 = vmatmul.mubr.f32.vlgmr.msra.gmra.mrb[0].mxu1 %v8616_v17 }
 0x648   : > { %8634 = vmatpush1.msra.mxu1 %v8633_v50  ;;  %8697 = vmatprep.mubr.f32.mxu1 %v9369_v1 }
 0x649   : > { %8707 = vmatprep.subr.mxu1 %v8624_v20 }
 0x64f   : > { %8699 = vmatmul.mubr.f32.vlgmr.msra.gmra.mrb[0].mxu1 %v8612_v0 }
 0x650   : > { %8710 = vmatpush1.msra.mxu1 %v8630_v40  ;;  %8773 = vmatprep.mubr.f32.mxu1 %v9369_v1 }
 0x651   : > { %8783 = vmatprep.subr.mxu1 %v8545_v56 }
 0x657   : > { %8776 = vmatmul.mubr.f32.vlgmr.msra.gmra.mrb[0].mxu1 %v8613_v14 }
 0x658   : > { %8785 = vmatpush1.msra.mxu1 %v8547_v41  ;;  %8848 = vmatprep.mubr.f32.mxu1 %v9369_v1 }
 0x659   : > { %8861 = vmatprep.subr.mxu1 %v8625_v19 }
 0x65f   : > { %8852 = vmatmul.mubr.f32.vlgmr.msra.gmra.mrb[0].mxu1 %v8614_v13 }
 0x660   : > { %8865 = vmatpush1.msra.mxu1 %v8631_v45  ;;  %8928 = vmatprep.mubr.f32.mxu1 %v9369_v1 }
 0x661   : > { %8937 = vmatprep.subr.mxu1 %v8545_v56 }
 0x667   : > { %8930 = vmatmul.mubr.f32.vlgmr.msra.gmra.mrb[0].mxu1 %v8612_v0 }
 0x668   : > { %8939 = vmatpush1.msra.mxu1 %v8547_v41  ;;  %9002 = vmatprep.mubr.f32.mxu1 %v9369_v1 }
 0x66f   : > { %9004 = vmatmul.mubr.f32.vlgmr.msra.gmra.mrb[0].mxu1 %v8612_v0 }
 0x742   : > { %v9005_v18 = vpop.f32.mrb[0].mxu1 }
 0x743   : > { %v9018_v21 = vadd.f32 %v9016_v12, %v9005_v18  ;;  %v9007_v49 = vpop.f32.mrb[1].mxu1 }
 0x744   : > { %v9019_v11 = vadd.f32 %v9016_v12, %v9007_v49 }
 0x745   : > { %v9024_v33 = vmul.f32 %v9018_v21, %v9018_v21 }
 0x746   : > { %v9020_v22 = vadd.f32 %v9019_v11, %v9018_v21  ;;  %v9025_v63 = vmul.f32 %v9019_v11, %v9019_v11 }
 0x748   : > { %9021 = vadd.xlane.f32.xlu1 %v9020_v22  ;;  %v9026_v23 = vadd.f32 %v9025_v63, %v9024_v33 }
 0x74a   : > { %9027 = vadd.xlane.f32.xlu0 %v9026_v23 }
 0x7d5   : > { %v9022_v34 = vpop.xlane.xlu1 %9021 }
 0x7d6   : > { %v9023_v62 = vmul.f32 0.00390625, %v9022_v34 }
 0x7d7   : > { %v9028_v24 = vpop.xlane.xlu0 %9027 }
 0x7d8   : > { %v9029_v26 = vmul.f32 0.00390625, %v9028_v24  ;;  %v9030_v1 = vmul.f32 %v9023_v62, %v9023_v62  ;;  %v9032_v39 = vsub.f32 %v9018_v21, %v9023_v62  ;;  %v9033_v60 = vsub.f32 %v9019_v11, %v9023_v62 }
 0x7da   : > { %v9031_v27 = vsub.f32 %v9029_v26, %v9030_v1 }
 0x7dc   : > { %v9034_v28 = vadd.f32 1e-05, %v9031_v27 }
 0x7de   : > { %9356 = vrsqrt.f32 %v9034_v28 }
 0x7e8   : > { %v9357_v46 = vpop.eup %9356 }
 0x7e9   : > { %v9036_v9 = vmul.f32 %v9357_v46, %v9032_v39  ;;  %v9037_v48 = vmul.f32 %v9357_v46, %v9033_v60 }
 0x7eb   : > { %v9038_v31 = vadd.f32 %v9358_v30, %v9036_v9  ;;  %v9039_v25 = vadd.f32 %v9359_v32, %v9037_v48 }
 0x7ed   : > { %9040 = vst [vmem:[%s251_s27] sm:$0xff] %v9038_v31  ;;  %9041 = vst [vmem:[%s251_s27 + $0x8] sm:$0xff] %v9039_v25 }
 0x7ee PF: > { %s16_s21 = sadd.s32 1, %s9366_s21  }
 0x7ef   : > { %p13_p4 = scmp.ge.s32.totalorder %s16_s21, 4  }
 0x7f1   :  { %15 = sbr.rel (!%p13_p4) target bundleno = 1 (0x1), region = 91 }

</bundles_post_ra>
